<compile_context>
chip_gen: v6e
topology: v6e:2x2x1
jax: 0.10.0
libtpu: 0.0.40
codegen_flags: <defaults>
</compile_context>

<pallas_src>
import math
import jax
import jax.numpy as jnp
from jax import lax
from jax.experimental import pallas as pl
from jax.experimental.pallas import tpu as pltpu


def _round_up(x, m):
    return (x + m - 1) // m * m


def _choose_tb(batch, num_choices):
    """Questions per grid step.

    Aim for a lane-dense ~128-wide score row per step (TB*C >= 128) so the fc2
    output store is unmasked, but never collapse the whole batch into a single
    grid step when batch >= 2 (v7x has 2 TensorCores that only split parallel
    grid axes with >= 2 iterations).
    """
    tb = max(1, 128 // max(1, num_choices))
    tb = min(tb, batch)
    if batch >= 2:
        tb = min(tb, -(-batch // 2))   # keep >= 2 grid steps
    return max(tb, 1)


def qa_kernel(q_ref, c_ref, wq_ref, wc_ref, w1a_ref, w1b_ref, b_ref, w2_ref, out_ref):
    """One grid step = TB questions and their TB*C choices (eval-mode forward)."""
    f32, bf16 = jnp.float32, jnp.bfloat16

    q = q_ref[0].astype(bf16)            # (TB,   E_pad)
    c = c_ref[0].astype(bf16)            # (TB*C, E_pad)

    bq = b_ref[0:1, :]                   # (1, H) f32 biases with eval-BN folded in
    bc = b_ref[1:2, :]
    b1 = b_ref[2:3, :]

    # Question / choice projections: Linear(+BN folded) + ReLU (Dropout == identity).
    pq = jnp.maximum(jnp.dot(q, wq_ref[...], preferred_element_type=f32) + bq, 0.0)   # (TB, H)
    pc = jnp.maximum(jnp.dot(c, wc_ref[...], preferred_element_type=f32) + bc, 0.0)   # (TB*C, H)

    # fc1(concat([q_expanded, proj_choices])) == pq @ W1a + pc @ W1b.
    # Split K=128 dots kept on purpose (v5e MXU depth); fuse to K=2H only if a
    # v6e/v7x profile shows the MXU-push slot binding.
    qpart = jnp.dot(pq.astype(bf16), w1a_ref[...], preferred_element_type=f32)        # (TB, H)
    cpart = jnp.dot(pc.astype(bf16), w1b_ref[...], preferred_element_type=f32)        # (TB*C, H)

    tb, h = qpart.shape
    nc = cpart.shape[0] // tb
    # Broadcast each question's fc1 contribution over its C choices on the VPU
    # (no one-hot expand matmul).
    qexp = jnp.broadcast_to(qpart[:, None, :], (tb, nc, h)).reshape(tb * nc, h)
    x = jnp.maximum(qexp + cpart + b1, 0.0)                                            # (TB*C, H)

    # fc2 emitted as one lane-dense (1, TB*C) row: scores = w2 @ x^T.
    # (fc2 bias is a scalar and is added in the wrapper -- keeps a (1,1) VMEM
    #  block + its DMA stream out of the kernel.)
    scores = lax.dot_general(w2_ref[...], x.astype(bf16),
                             dimension_numbers=(((1,), (1,)), ((), ())),
                             preferred_element_type=f32)                               # (1, TB*C)
    out_ref[0] = scores


def _const_spec(shape, single_buffer):
    """Resident (grid-invariant) weight/bias block."""
    idx = lambda *_: (0,) * len(shape)
    if single_buffer:
        # Grid-invariant block: one VMEM copy is enough; the default double
        # buffer is wasted headroom (matters most on v7x's 64 MiB VMEM).
        return pl.BlockSpec(shape, idx, pipeline_mode=pl.Buffered(1))
    return pl.BlockSpec(shape, idx)


def _forward_call(q, c, params, nb, tb, C, E_pad, H, single_buffer):
    grid_spec = pltpu.PrefetchScalarGridSpec(
        num_scalar_prefetch=0,
        grid=(nb,),
        in_specs=[
            pl.BlockSpec((1, tb, E_pad), lambda i: (i, 0, 0)),        # question tile
            pl.BlockSpec((1, tb * C, E_pad), lambda i: (i, 0, 0)),    # choice tile
            _const_spec((E_pad, H), single_buffer),                   # wq  (bf16)
            _const_spec((E_pad, H), single_buffer),                   # wc  (bf16)
            _const_spec((H, H), single_buffer),                       # w1a (question half)
            _const_spec((H, H), single_buffer),                       # w1b (choice half)
            _const_spec((3, H), single_buffer),                       # [bq; bc; b1] (f32)
            _const_spec((1, H), single_buffer),                       # w2 (bf16, torch layout)
        ],
        out_specs=pl.BlockSpec((1, 1, tb * C), lambda i: (i, 0, 0)),  # lane-dense score row
    )
    # VMEM budget (per TensorCore): resident weights ~(2*E_pad*H + 2*H*H) bf16
    # (~0.3 MiB here), activation tiles ~4B * TB*(C+1)*E_pad per buffer.
    # v7x: 64 MiB physical / 32 MiB default scoped -- set
    # pltpu.CompilerParams(vmem_limit_bytes=...) explicitly only once the
    # TB*C*E_pad activation tiles approach the default scoped limit (not needed
    # at these sizes).
    return pl.pallas_call(
        qa_kernel,
        out_shape=jax.ShapeDtypeStruct((nb, 1, tb * C), jnp.float32),
        grid_spec=grid_spec,
        compiler_params=pltpu.CompilerParams(dimension_semantics=("parallel",)),
    )(q, c, params["wq"], params["wc"], params["w1a"], params["w1b"],
      params["biases"], params["w2"])


def qa_classifier_forward(question, choices, params, *, tb=None):
    B, C, E = choices.shape
    E_pad, H = params["wq"].shape            # weights are already zero-padded to E_pad
    if tb is None:
        tb = _choose_tb(B, C)
    nb = -(-B // tb)                         # number of (parallel) grid steps
    B_pad = nb * tb

    # Pad the batch tail (zeros) and the contraction dim E -> E_pad (128-aligned)
    # once here; the f32->bf16 casts stay inside the kernel.
    q = jnp.pad(question, ((0, B_pad - B), (0, E_pad - E))).reshape(nb, tb, E_pad)
    c = jnp.pad(choices, ((0, B_pad - B), (0, 0), (0, E_pad - E))).reshape(nb, tb * C, E_pad)

    single_buffer = hasattr(pl, "Buffered")
    try:
        out = _forward_call(q, c, params, nb, tb, C, E_pad, H, single_buffer)
    except Exception:
        if not single_buffer:
            raise
        # Fallback for JAX versions where single-buffered resident blocks
        # (pipeline_mode=pl.Buffered(1)) are not supported by the TPU lowering.
        out = _forward_call(q, c, params, nb, tb, C, E_pad, H, False)

    return out.reshape(B_pad, C)[:B] + params["b2"]


def _kaiming_uniform(key, out_f, in_f):
    # nn.init.kaiming_uniform_(a=0, mode='fan_in', nonlinearity='relu')
    bound = math.sqrt(6.0 / in_f)
    return jax.random.uniform(key, (out_f, in_f), jnp.float32, -bound, bound)


def fold_bn_into_linear(w_t, b, gamma, beta, mean, var, eps=1e-5):
    """Fold eval-mode BatchNorm1d into the preceding Linear.

    w_t: (in, out) transposed weight, b: (out,) bias.
    Returns (w_t', b') with  x @ w_t' + b'  ==  BN(x @ w_t + b).
    """
    s = gamma / jnp.sqrt(var + eps)
    return w_t * s[None, :], (b - mean) * s + beta


def init_params(key, embedding_dim, hidden_dim):
    E, H = embedding_dim, hidden_dim
    E_pad = _round_up(E, 128)                 # 300 -> 384: aligned vreg loads per step
    kq, kc, k1, k2 = jax.random.split(key, 4)

    # PyTorch init: kaiming_uniform weights, zero biases.
    wq = _kaiming_uniform(kq, H, E)           # (H, E)  PyTorch layout
    wc = _kaiming_uniform(kc, H, E)
    w1 = _kaiming_uniform(k1, H, 2 * H)       # (H, 2H)
    w2 = _kaiming_uniform(k2, 1, H)           # (1, H)
    zH = jnp.zeros((H,), jnp.float32)

    # Default BatchNorm1d eval stats: gamma=1, beta=0, running_mean=0, running_var=1.
    # TODO(synk): for a trained checkpoint, fold the real gamma/beta/running stats here.
    ones = jnp.ones((H,), jnp.float32)
    zeros = jnp.zeros((H,), jnp.float32)

    wq_t, bq = fold_bn_into_linear(wq.T, zH, ones, zeros, zeros, ones)   # (E, H), (H,)
    wc_t, bc = fold_bn_into_linear(wc.T, zH, ones, zeros, zeros, ones)
    w1_t, b1 = fold_bn_into_linear(w1.T, zH, ones, zeros, zeros, ones)   # (2H, H), (H,)

    pad_e = ((0, E_pad - E), (0, 0))
    bf16 = jnp.bfloat16
    return dict(
        wq=jnp.pad(wq_t, pad_e).astype(bf16),          # (E_pad, H)
        wc=jnp.pad(wc_t, pad_e).astype(bf16),
        # combined = [question_expanded | projected_choices]
        w1a=w1_t[:H, :].astype(bf16),                  # (H, H) question half
        w1b=w1_t[H:, :].astype(bf16),                  # (H, H) choice half
        biases=jnp.stack([bq, bc, b1], axis=0),        # (3, H) f32, BN folded in
        w2=w2.astype(bf16),                            # (1, H) PyTorch layout
        b2=jnp.zeros((), jnp.float32),                 # fc2 bias (zero init), added in wrapper
    )


def reference_forward(question, choices, params):
    """Pure-JAX reference with the same bf16 matmul rounding as the kernel."""
    B, C, E = choices.shape
    E_pad = params["wq"].shape[0]
    q = jnp.pad(question, ((0, 0), (0, E_pad - E)))
    cf = jnp.pad(choices, ((0, 0), (0, 0), (0, E_pad - E))).reshape(B * C, E_pad)

    def mm(x, w_bf16):
        return jnp.dot(x.astype(jnp.bfloat16), w_bf16,
                       preferred_element_type=jnp.float32)

    bq, bc, b1 = params["biases"][0], params["biases"][1], params["biases"][2]
    pq = jnp.maximum(mm(q, params["wq"]) + bq, 0.0)
    pc = jnp.maximum(mm(cf, params["wc"]) + bc, 0.0)
    qexp = jnp.repeat(pq, C, axis=0)
    x = jnp.maximum(mm(qexp, params["w1a"]) + mm(pc, params["w1b"]) + b1, 0.0)
    out = mm(x, params["w2"].T) + params["b2"]
    return out.reshape(B, C)


if __name__ == "__main__":
    # embedding_dim=300, hidden_dim=128 per the surrounding spec code.
    E, H = 300, 128
    key = jax.random.PRNGKey(0)
    params = init_params(jax.random.fold_in(key, 7), E, H)

    # (2, 4): even batch; (3, 4): odd batch exercising the padded tail tile.
    for B, C in ((2, 4), (3, 4)):
        kq_b, kc_b = jax.random.split(jax.random.fold_in(key, B), 2)
        question = jax.random.normal(kq_b, (B, E), jnp.float32)
        choices = jax.random.normal(kc_b, (B, C, E), jnp.float32)

        out = jax.block_until_ready(qa_classifier_forward(question, choices, params))
        ref = reference_forward(question, choices, params)

        assert out.shape == (B, C), out.shape
        assert jnp.allclose(out, ref, atol=2e-3, rtol=2e-3), (out, ref)

    print("KERNEL_OK")
</pallas_src>

<mosaic_0001>
module attributes {stable_mosaic.version = 11 : i64} {
  func.func @qa_kernel(%arg0: i32, %arg1: memref<1x1x384xf32, #tpu.memory_space<vmem>>, %arg2: memref<1x4x384xf32, #tpu.memory_space<vmem>>, %arg3: memref<384x128xbf16, #tpu.memory_space<vmem>>, %arg4: memref<384x128xbf16, #tpu.memory_space<vmem>>, %arg5: memref<128x128xbf16, #tpu.memory_space<vmem>>, %arg6: memref<128x128xbf16, #tpu.memory_space<vmem>>, %arg7: memref<3x128xf32, #tpu.memory_space<vmem>>, %arg8: memref<1x128xbf16, #tpu.memory_space<vmem>>, %arg9: memref<1x1x4xf32, #tpu.memory_space<vmem>>) attributes {dimension_semantics = [#tpu.dimension_semantics<parallel>], iteration_bounds = array<i64: 2>, scalar_prefetch = 0 : i64, scratch_operands = 0 : i64, tpu.core_type = #tpu.core_type<tc>, window_params = [{transform_indices = @transform_0, window_bounds = array<i64: 1, 1, 384>}, {transform_indices = @transform_1, window_bounds = array<i64: 1, 4, 384>}, {pipeline_mode = #tpu.pipeline_mode<synchronous>, transform_indices = @transform_2, window_bounds = array<i64: 384, 128>}, {pipeline_mode = #tpu.pipeline_mode<synchronous>, transform_indices = @transform_3, window_bounds = array<i64: 384, 128>}, {pipeline_mode = #tpu.pipeline_mode<synchronous>, transform_indices = @transform_4, window_bounds = array<i64: 128, 128>}, {pipeline_mode = #tpu.pipeline_mode<synchronous>, transform_indices = @transform_5, window_bounds = array<i64: 128, 128>}, {pipeline_mode = #tpu.pipeline_mode<synchronous>, transform_indices = @transform_6, window_bounds = array<i64: 3, 128>}, {pipeline_mode = #tpu.pipeline_mode<synchronous>, transform_indices = @transform_7, window_bounds = array<i64: 1, 128>}, {transform_indices = @transform_8, window_bounds = array<i64: 1, 1, 4>}]} {
    %c0 = arith.constant 0 : index
    %c0_0 = arith.constant 0 : index
    %c0_1 = arith.constant 0 : index
    %0 = vector.load %arg1[%c0, %c0_0, %c0_1] : memref<1x1x384xf32, #tpu.memory_space<vmem>>, vector<1x1x384xf32>
    %1 = vector.shape_cast %0 : vector<1x1x384xf32> to vector<1x384xf32>
    %2 = arith.truncf %1 : vector<1x384xf32> to vector<1x384xbf16>
    %c0_2 = arith.constant 0 : index
    %c0_3 = arith.constant 0 : index
    %c0_4 = arith.constant 0 : index
    %3 = vector.load %arg2[%c0_2, %c0_3, %c0_4] : memref<1x4x384xf32, #tpu.memory_space<vmem>>, vector<1x4x384xf32>
    %4 = vector.shape_cast %3 : vector<1x4x384xf32> to vector<4x384xf32>
    %5 = arith.truncf %4 : vector<4x384xf32> to vector<4x384xbf16>
    %c0_5 = arith.constant 0 : index
    %c0_6 = arith.constant 0 : index
    %6 = vector.load %arg7[%c0_5, %c0_6] : memref<3x128xf32, #tpu.memory_space<vmem>>, vector<1x128xf32>
    %c1 = arith.constant 1 : index
    %c0_7 = arith.constant 0 : index
    %7 = vector.load %arg7[%c1, %c0_7] : memref<3x128xf32, #tpu.memory_space<vmem>>, vector<1x128xf32>
    %c2 = arith.constant 2 : index
    %c0_8 = arith.constant 0 : index
    %8 = vector.load %arg7[%c2, %c0_8] : memref<3x128xf32, #tpu.memory_space<vmem>>, vector<1x128xf32>
    %c0_9 = arith.constant 0 : index
    %c0_10 = arith.constant 0 : index
    %9 = vector.load %arg3[%c0_9, %c0_10] : memref<384x128xbf16, #tpu.memory_space<vmem>>, vector<384x128xbf16>
    %cst = arith.constant dense<0.000000e+00> : vector<1x128xf32>
    %10 = tpu.matmul %2, %9, %cst {dimension_numbers = #tpu.dot_dimension_numbers<[1], [0], [0], [1], [0, 0, 1, 1], [], []>} : vector<1x384xbf16>, vector<384x128xbf16>, vector<1x128xf32> -> vector<1x128xf32>
    %11 = arith.addf %10, %6 : vector<1x128xf32>
    %cst_11 = arith.constant 0.000000e+00 : f32
    %12 = vector.broadcast %cst_11 : f32 to vector<1x128xf32>
    %13 = arith.maximumf %11, %12 : vector<1x128xf32>
    %c0_12 = arith.constant 0 : index
    %c0_13 = arith.constant 0 : index
    %14 = vector.load %arg4[%c0_12, %c0_13] : memref<384x128xbf16, #tpu.memory_space<vmem>>, vector<384x128xbf16>
    %cst_14 = arith.constant dense<0.000000e+00> : vector<4x128xf32>
    %15 = tpu.matmul %5, %14, %cst_14 {dimension_numbers = #tpu.dot_dimension_numbers<[1], [0], [0], [1], [0, 0, 1, 1], [], []>} : vector<4x384xbf16>, vector<384x128xbf16>, vector<4x128xf32> -> vector<4x128xf32>
    %16 = vector.broadcast %7 : vector<1x128xf32> to vector<4x128xf32>
    %17 = arith.addf %15, %16 : vector<4x128xf32>
    %cst_15 = arith.constant 0.000000e+00 : f32
    %18 = vector.broadcast %cst_15 : f32 to vector<4x128xf32>
    %19 = arith.maximumf %17, %18 : vector<4x128xf32>
    %20 = arith.truncf %13 : vector<1x128xf32> to vector<1x128xbf16>
    %c0_16 = arith.constant 0 : index
    %c0_17 = arith.constant 0 : index
    %21 = vector.load %arg5[%c0_16, %c0_17] : memref<128x128xbf16, #tpu.memory_space<vmem>>, vector<128x128xbf16>
    %cst_18 = arith.constant dense<0.000000e+00> : vector<1x128xf32>
    %22 = tpu.matmul %20, %21, %cst_18 {dimension_numbers = #tpu.dot_dimension_numbers<[1], [0], [0], [1], [0, 0, 1, 1], [], []>} : vector<1x128xbf16>, vector<128x128xbf16>, vector<1x128xf32> -> vector<1x128xf32>
    %23 = arith.truncf %19 : vector<4x128xf32> to vector<4x128xbf16>
    %c0_19 = arith.constant 0 : index
    %c0_20 = arith.constant 0 : index
    %24 = vector.load %arg6[%c0_19, %c0_20] : memref<128x128xbf16, #tpu.memory_space<vmem>>, vector<128x128xbf16>
    %cst_21 = arith.constant dense<0.000000e+00> : vector<4x128xf32>
    %25 = tpu.matmul %23, %24, %cst_21 {dimension_numbers = #tpu.dot_dimension_numbers<[1], [0], [0], [1], [0, 0, 1, 1], [], []>} : vector<4x128xbf16>, vector<128x128xbf16>, vector<4x128xf32> -> vector<4x128xf32>
    %26 = vector.shape_cast %22 : vector<1x128xf32> to vector<1x1x128xf32>
    %27 = vector.shape_cast %26 : vector<1x1x128xf32> to vector<1x1x128xf32>
    %28 = vector.broadcast %27 : vector<1x1x128xf32> to vector<1x4x128xf32>
    %29 = vector.shape_cast %28 : vector<1x4x128xf32> to vector<4x128xf32>
    %30 = arith.addf %29, %25 : vector<4x128xf32>
    %31 = vector.broadcast %8 : vector<1x128xf32> to vector<4x128xf32>
    %32 = arith.addf %30, %31 : vector<4x128xf32>
    %cst_22 = arith.constant 0.000000e+00 : f32
    %33 = vector.broadcast %cst_22 : f32 to vector<4x128xf32>
    %34 = arith.maximumf %32, %33 : vector<4x128xf32>
    %c0_23 = arith.constant 0 : index
    %c0_24 = arith.constant 0 : index
    %35 = vector.load %arg8[%c0_23, %c0_24] : memref<1x128xbf16, #tpu.memory_space<vmem>>, vector<1x128xbf16>
    %36 = arith.truncf %34 : vector<4x128xf32> to vector<4x128xbf16>
    %cst_25 = arith.constant dense<0.000000e+00> : vector<1x4xf32>
    %37 = tpu.matmul %35, %36, %cst_25 {dimension_numbers = #tpu.dot_dimension_numbers<[1], [1], [0], [0], [0, 0, 1, 0], [], []>} : vector<1x128xbf16>, vector<4x128xbf16>, vector<1x4xf32> -> vector<1x4xf32>
    %c0_26 = arith.constant 0 : index
    %c0_27 = arith.constant 0 : index
    %c0_28 = arith.constant 0 : index
    %38 = vector.load %arg9[%c0_26, %c0_27, %c0_28] : memref<1x1x4xf32, #tpu.memory_space<vmem>>, vector<1x1x4xf32>
    %39 = vector.shape_cast %38 : vector<1x1x4xf32> to vector<1x4xf32>
    %40 = vector.shape_cast %37 : vector<1x4xf32> to vector<1x1x4xf32>
    tpu.vector_store %arg9[%c0_26, %c0_27, %c0_28], %40 {strides = array<i32>} : memref<1x1x4xf32, #tpu.memory_space<vmem>>, vector<1x1x4xf32>,
    return
  }
  func.func @transform_0(%arg0: i32) -> (i32, i32, i32) {
    %c0_i32 = arith.constant 0 : i32
    %c0_i32_0 = arith.constant 0 : i32
    %c0_i32_1 = arith.constant 0 : i32
    return %arg0, %c0_i32, %c0_i32_0 : i32, i32, i32
  }
  func.func @transform_1(%arg0: i32) -> (i32, i32, i32) {
    %c0_i32 = arith.constant 0 : i32
    %c0_i32_0 = arith.constant 0 : i32
    %c0_i32_1 = arith.constant 0 : i32
    return %arg0, %c0_i32, %c0_i32_0 : i32, i32, i32
  }
  func.func @transform_2(%arg0: i32) -> (i32, i32) {
    %c0_i32 = arith.constant 0 : i32
    %c0_i32_0 = arith.constant 0 : i32
    %c0_i32_1 = arith.constant 0 : i32
    return %c0_i32, %c0_i32_0 : i32, i32
  }
  func.func @transform_3(%arg0: i32) -> (i32, i32) {
    %c0_i32 = arith.constant 0 : i32
    %c0_i32_0 = arith.constant 0 : i32
    %c0_i32_1 = arith.constant 0 : i32
    return %c0_i32, %c0_i32_0 : i32, i32
  }
  func.func @transform_4(%arg0: i32) -> (i32, i32) {
    %c0_i32 = arith.constant 0 : i32
    %c0_i32_0 = arith.constant 0 : i32
    %c0_i32_1 = arith.constant 0 : i32
    return %c0_i32, %c0_i32_0 : i32, i32
  }
  func.func @transform_5(%arg0: i32) -> (i32, i32) {
    %c0_i32 = arith.constant 0 : i32
    %c0_i32_0 = arith.constant 0 : i32
    %c0_i32_1 = arith.constant 0 : i32
    return %c0_i32, %c0_i32_0 : i32, i32
  }
  func.func @transform_6(%arg0: i32) -> (i32, i32) {
    %c0_i32 = arith.constant 0 : i32
    %c0_i32_0 = arith.constant 0 : i32
    %c0_i32_1 = arith.constant 0 : i32
    return %c0_i32, %c0_i32_0 : i32, i32
  }
  func.func @transform_7(%arg0: i32) -> (i32, i32) {
    %c0_i32 = arith.constant 0 : i32
    %c0_i32_0 = arith.constant 0 : i32
    %c0_i32_1 = arith.constant 0 : i32
    return %c0_i32, %c0_i32_0 : i32, i32
  }
  func.func @transform_8(%arg0: i32) -> (i32, i32, i32) {
    %c0_i32 = arith.constant 0 : i32
    %c0_i32_0 = arith.constant 0 : i32
    %c0_i32_1 = arith.constant 0 : i32
    return %arg0, %c0_i32, %c0_i32_0 : i32, i32, i32
  }
}

module attributes {stable_mosaic.version = 11 : i64} {
  func.func @qa_kernel(%arg0: i32, %arg1: memref<1x1x384xf32, #tpu.memory_space<vmem>>, %arg2: memref<1x4x384xf32, #tpu.memory_space<vmem>>, %arg3: memref<384x128xbf16, #tpu.memory_space<vmem>>, %arg4: memref<384x128xbf16, #tpu.memory_space<vmem>>, %arg5: memref<128x128xbf16, #tpu.memory_space<vmem>>, %arg6: memref<128x128xbf16, #tpu.memory_space<vmem>>, %arg7: memref<3x128xf32, #tpu.memory_space<vmem>>, %arg8: memref<1x128xbf16, #tpu.memory_space<vmem>>, %arg9: memref<1x1x4xf32, #tpu.memory_space<vmem>>) attributes {dimension_semantics = [#tpu.dimension_semantics<parallel>], iteration_bounds = array<i64: 2>, scalar_prefetch = 0 : i64, scratch_operands = 0 : i64, tpu.core_type = #tpu.core_type<tc>, window_params = [{transform_indices = @transform_0, window_bounds = array<i64: 1, 1, 384>}, {transform_indices = @transform_1, window_bounds = array<i64: 1, 4, 384>}, {pipeline_mode = #tpu.pipeline_mode<synchronous>, transform_indices = @transform_2, window_bounds = array<i64: 384, 128>}, {pipeline_mode = #tpu.pipeline_mode<synchronous>, transform_indices = @transform_3, window_bounds = array<i64: 384, 128>}, {pipeline_mode = #tpu.pipeline_mode<synchronous>, transform_indices = @transform_4, window_bounds = array<i64: 128, 128>}, {pipeline_mode = #tpu.pipeline_mode<synchronous>, transform_indices = @transform_5, window_bounds = array<i64: 128, 128>}, {pipeline_mode = #tpu.pipeline_mode<synchronous>, transform_indices = @transform_6, window_bounds = array<i64: 3, 128>}, {pipeline_mode = #tpu.pipeline_mode<synchronous>, transform_indices = @transform_7, window_bounds = array<i64: 1, 128>}, {transform_indices = @transform_8, window_bounds = array<i64: 1, 1, 4>}]} {
    %c0 = arith.constant 0 : index
    %c0_0 = arith.constant 0 : index
    %c0_1 = arith.constant 0 : index
    %0 = vector.load %arg1[%c0, %c0_0, %c0_1] : memref<1x1x384xf32, #tpu.memory_space<vmem>>, vector<1x1x384xf32>
    %1 = vector.shape_cast %0 : vector<1x1x384xf32> to vector<1x384xf32>
    %2 = arith.truncf %1 : vector<1x384xf32> to vector<1x384xbf16>
    %c0_2 = arith.constant 0 : index
    %c0_3 = arith.constant 0 : index
    %c0_4 = arith.constant 0 : index
    %3 = vector.load %arg2[%c0_2, %c0_3, %c0_4] : memref<1x4x384xf32, #tpu.memory_space<vmem>>, vector<1x4x384xf32>
    %4 = vector.shape_cast %3 : vector<1x4x384xf32> to vector<4x384xf32>
    %5 = arith.truncf %4 : vector<4x384xf32> to vector<4x384xbf16>
    %c0_5 = arith.constant 0 : index
    %c0_6 = arith.constant 0 : index
    %6 = vector.load %arg7[%c0_5, %c0_6] : memref<3x128xf32, #tpu.memory_space<vmem>>, vector<1x128xf32>
    %c1 = arith.constant 1 : index
    %c0_7 = arith.constant 0 : index
    %7 = vector.load %arg7[%c1, %c0_7] : memref<3x128xf32, #tpu.memory_space<vmem>>, vector<1x128xf32>
    %c2 = arith.constant 2 : index
    %c0_8 = arith.constant 0 : index
    %8 = vector.load %arg7[%c2, %c0_8] : memref<3x128xf32, #tpu.memory_space<vmem>>, vector<1x128xf32>
    %c0_9 = arith.constant 0 : index
    %c0_10 = arith.constant 0 : index
    %9 = vector.load %arg3[%c0_9, %c0_10] : memref<384x128xbf16, #tpu.memory_space<vmem>>, vector<384x128xbf16>
    %cst = arith.constant dense<0.000000e+00> : vector<1x128xf32>
    %10 = tpu.matmul %2, %9, %cst {dimension_numbers = #tpu.dot_dimension_numbers<[1], [0], [0], [1], [0, 0, 1, 1], [], []>} : vector<1x384xbf16>, vector<384x128xbf16>, vector<1x128xf32> -> vector<1x128xf32>
    %11 = arith.addf %10, %6 : vector<1x128xf32>
    %cst_11 = arith.constant 0.000000e+00 : f32
    %12 = vector.broadcast %cst_11 : f32 to vector<1x128xf32>
    %13 = arith.maximumf %11, %12 : vector<1x128xf32>
    %c0_12 = arith.constant 0 : index
    %c0_13 = arith.constant 0 : index
    %14 = vector.load %arg4[%c0_12, %c0_13] : memref<384x128xbf16, #tpu.memory_space<vmem>>, vector<384x128xbf16>
    %cst_14 = arith.constant dense<0.000000e+00> : vector<4x128xf32>
    %15 = tpu.matmul %5, %14, %cst_14 {dimension_numbers = #tpu.dot_dimension_numbers<[1], [0], [0], [1], [0, 0, 1, 1], [], []>} : vector<4x384xbf16>, vector<384x128xbf16>, vector<4x128xf32> -> vector<4x128xf32>
    %16 = vector.broadcast %7 : vector<1x128xf32> to vector<4x128xf32>
    %17 = arith.addf %15, %16 : vector<4x128xf32>
    %cst_15 = arith.constant 0.000000e+00 : f32
    %18 = vector.broadcast %cst_15 : f32 to vector<4x128xf32>
    %19 = arith.maximumf %17, %18 : vector<4x128xf32>
    %20 = arith.truncf %13 : vector<1x128xf32> to vector<1x128xbf16>
    %c0_16 = arith.constant 0 : index
    %c0_17 = arith.constant 0 : index
    %21 = vector.load %arg5[%c0_16, %c0_17] : memref<128x128xbf16, #tpu.memory_space<vmem>>, vector<128x128xbf16>
    %cst_18 = arith.constant dense<0.000000e+00> : vector<1x128xf32>
    %22 = tpu.matmul %20, %21, %cst_18 {dimension_numbers = #tpu.dot_dimension_numbers<[1], [0], [0], [1], [0, 0, 1, 1], [], []>} : vector<1x128xbf16>, vector<128x128xbf16>, vector<1x128xf32> -> vector<1x128xf32>
    %23 = arith.truncf %19 : vector<4x128xf32> to vector<4x128xbf16>
    %c0_19 = arith.constant 0 : index
    %c0_20 = arith.constant 0 : index
    %24 = vector.load %arg6[%c0_19, %c0_20] : memref<128x128xbf16, #tpu.memory_space<vmem>>, vector<128x128xbf16>
    %cst_21 = arith.constant dense<0.000000e+00> : vector<4x128xf32>
    %25 = tpu.matmul %23, %24, %cst_21 {dimension_numbers = #tpu.dot_dimension_numbers<[1], [0], [0], [1], [0, 0, 1, 1], [], []>} : vector<4x128xbf16>, vector<128x128xbf16>, vector<4x128xf32> -> vector<4x128xf32>
    %26 = vector.shape_cast %22 : vector<1x128xf32> to vector<1x1x128xf32>
    %27 = vector.shape_cast %26 : vector<1x1x128xf32> to vector<1x1x128xf32>
    %28 = vector.broadcast %27 : vector<1x1x128xf32> to vector<1x4x128xf32>
    %29 = vector.shape_cast %28 : vector<1x4x128xf32> to vector<4x128xf32>
    %30 = arith.addf %29, %25 : vector<4x128xf32>
    %31 = vector.broadcast %8 : vector<1x128xf32> to vector<4x128xf32>
    %32 = arith.addf %30, %31 : vector<4x128xf32>
    %cst_22 = arith.constant 0.000000e+00 : f32
    %33 = vector.broadcast %cst_22 : f32 to vector<4x128xf32>
    %34 = arith.maximumf %32, %33 : vector<4x128xf32>
    %c0_23 = arith.constant 0 : index
    %c0_24 = arith.constant 0 : index
    %35 = vector.load %arg8[%c0_23, %c0_24] : memref<1x128xbf16, #tpu.memory_space<vmem>>, vector<1x128xbf16>
    %36 = arith.truncf %34 : vector<4x128xf32> to vector<4x128xbf16>
    %cst_25 = arith.constant dense<0.000000e+00> : vector<1x4xf32>
    %37 = tpu.matmul %35, %36, %cst_25 {dimension_numbers = #tpu.dot_dimension_numbers<[1], [1], [0], [0], [0, 0, 1, 0], [], []>} : vector<1x128xbf16>, vector<4x128xbf16>, vector<1x4xf32> -> vector<1x4xf32>
    %c0_26 = arith.constant 0 : index
    %c0_27 = arith.constant 0 : index
    %c0_28 = arith.constant 0 : index
    %38 = vector.load %arg9[%c0_26, %c0_27, %c0_28] : memref<1x1x4xf32, #tpu.memory_space<vmem>>, vector<1x1x4xf32>
    %39 = vector.shape_cast %38 : vector<1x1x4xf32> to vector<1x4xf32>
    %40 = vector.shape_cast %37 : vector<1x4xf32> to vector<1x1x4xf32>
    tpu.vector_store %arg9[%c0_26, %c0_27, %c0_28], %40 {strides = array<i32>} : memref<1x1x4xf32, #tpu.memory_space<vmem>>, vector<1x1x4xf32>,
    return
  }
  func.func @transform_0(%arg0: i32) -> (i32, i32, i32) {
    %c0_i32 = arith.constant 0 : i32
    %c0_i32_0 = arith.constant 0 : i32
    %c0_i32_1 = arith.constant 0 : i32
    return %arg0, %c0_i32, %c0_i32_0 : i32, i32, i32
  }
  func.func @transform_1(%arg0: i32) -> (i32, i32, i32) {
    %c0_i32 = arith.constant 0 : i32
    %c0_i32_0 = arith.constant 0 : i32
    %c0_i32_1 = arith.constant 0 : i32
    return %arg0, %c0_i32, %c0_i32_0 : i32, i32, i32
  }
  func.func @transform_2(%arg0: i32) -> (i32, i32) {
    %c0_i32 = arith.constant 0 : i32
    %c0_i32_0 = arith.constant 0 : i32
    %c0_i32_1 = arith.constant 0 : i32
    return %c0_i32, %c0_i32_0 : i32, i32
  }
  func.func @transform_3(%arg0: i32) -> (i32, i32) {
    %c0_i32 = arith.constant 0 : i32
    %c0_i32_0 = arith.constant 0 : i32
    %c0_i32_1 = arith.constant 0 : i32
    return %c0_i32, %c0_i32_0 : i32, i32
  }
  func.func @transform_4(%arg0: i32) -> (i32, i32) {
    %c0_i32 = arith.constant 0 : i32
    %c0_i32_0 = arith.constant 0 : i32
    %c0_i32_1 = arith.constant 0 : i32
    return %c0_i32, %c0_i32_0 : i32, i32
  }
  func.func @transform_5(%arg0: i32) -> (i32, i32) {
    %c0_i32 = arith.constant 0 : i32
    %c0_i32_0 = arith.constant 0 : i32
    %c0_i32_1 = arith.constant 0 : i32
    return %c0_i32, %c0_i32_0 : i32, i32
  }
  func.func @transform_6(%arg0: i32) -> (i32, i32) {
    %c0_i32 = arith.constant 0 : i32
    %c0_i32_0 = arith.constant 0 : i32
    %c0_i32_1 = arith.constant 0 : i32
    return %c0_i32, %c0_i32_0 : i32, i32
  }
  func.func @transform_7(%arg0: i32) -> (i32, i32) {
    %c0_i32 = arith.constant 0 : i32
    %c0_i32_0 = arith.constant 0 : i32
    %c0_i32_1 = arith.constant 0 : i32
    return %c0_i32, %c0_i32_0 : i32, i32
  }
  func.func @transform_8(%arg0: i32) -> (i32, i32, i32) {
    %c0_i32 = arith.constant 0 : i32
    %c0_i32_0 = arith.constant 0 : i32
    %c0_i32_1 = arith.constant 0 : i32
    return %arg0, %c0_i32, %c0_i32_0 : i32, i32, i32
  }
}

</mosaic_0001>

<bundles_post_ra>
// kernel: tpu_custom_call.1
= control target key start
LH: loop header
LB: loop body
LE: loop exit
PB: predicated region body
PF: predicated region fallthrough
CT: control target
= control target key end

     0   :  { %s2461_s0 = inlined_call_operand.hbm [shape: f32[2,1,384], index: 0, kind: input, shape index: {}]   ;;  %s2462_s1 = inlined_call_operand.hbm [shape: f32[2,4,384], index: 1, kind: input, shape index: {}]   ;;  %s2463_s2 = inlined_call_operand.hbm [shape: bf16[384,128], index: 2, kind: input, shape index: {}]   ;;  %s2464_s3 = inlined_call_operand.hbm [shape: bf16[384,128], index: 3, kind: input, shape index: {}]   ;;  %s2465_s4 = inlined_call_operand.hbm [shape: bf16[128,128], index: 4, kind: input, shape index: {}]   ;;  %s2466_s5 = inlined_call_operand.hbm [shape: bf16[128,128], index: 5, kind: input, shape index: {}]   ;;  %s2467_s6 = inlined_call_operand.vmem [shape: f32[3,128], index: 6, kind: input, shape index: {}]   ;;  %s2468_s7 = inlined_call_operand.vmem [shape: bf16[1,128], index: 7, kind: input, shape index: {}]   ;;  %s2469_s8 = inlined_call_operand.hbm [shape: f32[2,1,4], index: 8, kind: output, shape index: {}]  }
   0x1   :  { %2474 = sst [smem:[#allocation20_spill]] %s2461_s0 }
   0x2   :  { %2475 = sst [smem:[#allocation21_spill]] %s2463_s2 }
   0x3   :  { %2476 = sst [smem:[#allocation22_spill]] %s2464_s3 }
   0x4   :  { %2477 = sst [smem:[#allocation23_spill]] %s2465_s4 }
   0x5   :  { %13 = vsyncpa [#allocation3], 0 }
   0x6   :  { %15 = vsyncpa [#allocation3 + $0x1], 0 }
   0x7   :  { %16 = vsyncpa [#allocation6], 0 }
   0x8   :  { %18 = vsyncpa [#allocation6 + $0x1], 0 }
   0x9   :  { %19 = vsyncpa [#allocation9], 0 }
   0xa   :  { %20 = vsyncpa [#allocation12], 0 }
   0xb   :  { %21 = vsyncpa [#allocation4], 0 }
   0xc   :  { %23 = vsyncpa [#allocation4 + $0x1], 0  ;;  %s2120_s27 = smov 0   ;;  %s2122_s28 = smov 0  }
   0xd   :  { %s2124_s29 = smov 0   ;;  %s2126_s30 = smov 0  }
   0xe LB: > { %s2064_s9 = smov [#allocation7]   ;;  %s2141_s11 = sadd.s32 4294967295, %s2062_s30   ;;  %s2062_s30 = sphi %s2126_s30, %s2503_s30   ;;  %s2058_s29 = sphi %s2124_s29, %s2502_s29   ;;  %s2054_s28 = sphi %s2122_s28, %s2501_s28   ;;  %s2050_s27 = sphi %s2120_s27, %s2500_s27  }
   0xf   : > { %s250_s10 = sshll.u32 %s2064_s9, 4  ;;  %p1405_p0 = scmp.ge.s32.totalorder %s2062_s30, 1  ;;  %s251_s10 = int_to_ptr.vmem [resolvable:$true] %s250_s10 }
  0x10   : > { %p2470_p1 = scmp.eq.s32.totalorder %s2141_s11, 0  ;;  %p238_p2 = scmp.lt.s32.totalorder %s2062_s30, 3 }
  0x11   : > { %s2065_s13 = smov [#allocation8]   ;;  %s2066_s16 = smov [#allocation10]  }
  0x12   : > { %p2146_p3 = pnand %p1405_p0, %p238_p2  ;;  %s263_s14 = sshll.u32 %s2065_s13, 4  ;;  %s2159_s14 = int_to_ptr.vmem [resolvable:$true] %s263_s14 }
  0x13   : > { %s276_s17 = sshll.u32 %s2066_s16, 4  ;;  %s1833_s18 = scalar_lea.vmem %s251_s10, 3072  ;;  %s2161_s17 = int_to_ptr.vmem [resolvable:$true] %s276_s17 }
  0x14   : > { %s2478_s12 = scalar_select %p2146_p3, 1, 0 }
  0x15   : > { %p1683_p5 = pneg %p2146_p3  ;;  %p1834_p8 = scmp.ne.s32.totalorder %s251_s10, %s1833_s18 }
  0x16   : > { %p1841_p11 = scmp.lt.s32.totalorder %s251_s10, %s251_s10  ;;  %p1842_p12 = scmp.lt.s32.totalorder %s1833_s18, %s1833_s18 }
  0x17   : > { %p2155_p6 = pnand %p1683_p5, %p2470_p1 }
  0x18   : > { %p1843_p13 = por %p1842_p12, %p1841_p11 }
  0x19   : > { %p1824_p7 = pneg %p2155_p6 }
  0x1b   : > { %p1836_p9 = pnand %p1834_p8, %p1824_p7 }
  0x1d   : > { %p1837_p10 = pneg %p1836_p9 }
  0x1f   : > { %p1844_p0 = pnand %p1843_p13, %p1837_p10 }
  0x21   : > { %1847 = shalt.err (!%p1844_p0)
}
  0x22   : > { %s2067_s19 = smov 64   ;;  %s2068_s20 = smov 4  }
  0x23   : > { %s2480_s2 = sld [smem:[#allocation21_spill]]  ;;  %s1859_s23 = scalar_lea.vmem %s2159_s14, 3072 }
  0x24   : > { %p1860_p2 = scmp.ne.s32.totalorder %s2159_s14, %s1859_s23  ;;  %p1867_p9 = scmp.lt.s32.totalorder %s2159_s14, %s2159_s14 }
  0x25   : > { %p1868_p10 = scmp.lt.s32.totalorder %s1859_s23, %s1859_s23 }
  0x26   : > { %p1862_p5 = pnand %p1860_p2, %p1824_p7 }
  0x27   : > { %p1869_p11 = por %p1868_p10, %p1867_p9 }
  0x28   : > { %p1863_p8 = pneg %p1862_p5 }
  0x29   : > { %1686 = dma.hbm_to_vmem [thread:$0]  (!%p2155_p6), %s2480_s2, 3072, %s251_s10, [#allocation6], %s2067_s19, %s2067_s19, %s2068_s20  }
  0x2a   : > { %p1870_p12 = pnand %p1869_p11, %p1863_p8 }
  0x2c   : > { %1873 = shalt.err (!%p1870_p12)
}
  0x2d   : > { %s2481_s3 = sld [smem:[#allocation22_spill]]  ;;  %s1885_s26 = scalar_lea.vmem %s2161_s17, 1024 }
  0x2e   : > { %p1886_p13 = scmp.ne.s32.totalorder %s2161_s17, %s1885_s26  ;;  %p1893_p5 = scmp.lt.s32.totalorder %s2161_s17, %s2161_s17 }
  0x2f   : > { %p1894_p8 = scmp.lt.s32.totalorder %s1885_s26, %s1885_s26 }
  0x30   : > { %p1888_p0 = pnand %p1886_p13, %p1824_p7 }
  0x31   : > { %p1895_p9 = por %p1894_p8, %p1893_p5 }
  0x32   : > { %p1889_p2 = pneg %p1888_p0 }
  0x33   : > { %1689 = dma.hbm_to_vmem [thread:$0]  (!%p2155_p6), %s2481_s3, 3072, %s2159_s14, [#allocation9], %s2067_s19, %s2067_s19, %s2068_s20  }
  0x34   : > { %p1896_p10 = pnand %p1895_p9, %p1889_p2 }
  0x36   : > { %1899 = shalt.err (!%p1896_p10)
}
  0x37   : > { %s2482_s4 = sld [smem:[#allocation23_spill]]  ;;  %s2069_s13 = smov [#allocation11]  }
  0x38   : > { %s289_s14 = sshll.u32 %s2069_s13, 4  ;;  %s290_s14 = int_to_ptr.vmem [resolvable:$true] %s289_s14 }
  0x39   : > { %s1911_s16 = scalar_lea.vmem %s290_s14, 1024  ;;  %p1919_p0 = scmp.lt.s32.totalorder %s290_s14, %s290_s14 }
  0x3a   : > { %p1912_p11 = scmp.ne.s32.totalorder %s290_s14, %s1911_s16  ;;  %p1920_p2 = scmp.lt.s32.totalorder %s1911_s16, %s1911_s16 }
  0x3c   : > { %p1914_p12 = pnand %p1912_p11, %p1824_p7  ;;  %p1921_p5 = por %p1920_p2, %p1919_p0 }
  0x3d   : > { %1692 = dma.hbm_to_vmem [thread:$0]  (!%p2155_p6), %s2482_s4, 1024, %s2161_s17, [#allocation9], %s2067_s19, %s2067_s19, %s2068_s20  }
  0x3e   : > { %p1915_p13 = pneg %p1914_p12 }
  0x40   : > { %p1922_p8 = pnand %p1921_p5, %p1915_p13 }
  0x42   : > { %1925 = shalt.err (!%p1922_p8)
}
  0x43   : > { %1695 = dma.hbm_to_vmem [thread:$0]  (!%p2155_p6), %s2466_s5, 1024, %s290_s14, [#allocation12], %s2067_s19, %s2067_s19, %s2068_s20  }
  0x44   : > { %s1404_s15 = sadd.s32 4294967294, %s2062_s30   ;;  %s2221_s21 = sadd.s32 1, %s2062_s30  }
  0x45   : > { %s33_s22 = ssub.s32 %s2062_s30, %s2221_s21  ;;  %s36_s23 = sadd.s32 1, %s2058_s29 }
  0x46   : > { %p34_p7 = scmp.eq.s32.totalorder %s33_s22, 0  ;;  %p43_p9 = scmp.ne.s32.totalorder %s2058_s29, %s2054_s28 }
  0x47   : > { %p44_p10 = scmp.eq.s32.totalorder %s2062_s30, 0  ;;  %p49_p11 = scmp.ne.s32.totalorder %s2054_s28, %s2050_s27 }
  0x48   : > { %s2232_s24 = scalar_select %p34_p7, %s2058_s29, %s36_s23  }
  0x49   : > { %p45_p12 = por %p44_p10, %p43_p9  ;;  %p2236_p13 = por %p2470_p1, %p49_p11 }
  0x4a   : > { %p225_p6 = scmp.eq.s32.totalorder %s2141_s11, 1  ;;  %p231_p0 = scmp.eq.s32.totalorder %s1404_s15, 1 }
  0x4b   : > { %s2483_s25 = scalar_select %p2236_p13, 1, 0 }
  0x4c   : > { %p1711_p2 = scmp.lt.s32.totalorder %s2062_s30, 2  ;;  %s2243_s19 = sand.u32 1, %s2058_s29  }
  0x4d   : > { %p2245_p5 = por %p225_p6, %p43_p9  ;;  %p2249_p8 = por %p231_p0, %p49_p11 }
  0x4e   : > { %s1655_s9 = smul.u32 3, %s2243_s19  ;;  %p2255_p7 = pnand %p1711_p2, %p45_p12 }
  0x4f   : > { %s2484_s20 = scalar_select %p2245_p5, 1, 0 }
  0x50   : > { %s2485_s26 = scalar_select %p2249_p8, 1, 0 }
  0x51   : > { %s1656_s10 = smul.u32 48, %s2062_s30  ;;  %s2487_s0 = sld [smem:[#allocation20_spill]] }
  0x52   : > { %s313_s15 = scalar_lea.vmem [#allocation2], %s1655_s9  ;;  %s310_s23 = scalar_lea.sflag [#allocation3], %s2243_s19 }
  0x53   : > { %s321_s22 = sshll.u32 %s313_s15, 4  ;;  %p1928_p10 = pneg %p2255_p7  ;;  %s322_s22 = int_to_ptr.vmem [resolvable:$true] %s321_s22 }
  0x57   : > { %s2263_s18 = scalar_lea.hbm %s2487_s0, %s1656_s10  ;;  %s1931_s10 = scalar_lea.hbm %s2487_s0, 96 }
  0x58   : > { %s1926_s2 = scalar_lea.hbm %s2263_s18, 48  ;;  %p1932_p6 = scmp.lt.s32.totalorder %s2263_s18, %s2487_s0 }
  0x59   : > { %p1927_p9 = scmp.ne.s32.totalorder %s2263_s18, %s1926_s2  ;;  %p1933_p0 = scmp.lt.s32.totalorder %s1931_s10, %s1926_s2 }
  0x5b   : > { %p1929_p11 = pnand %p1928_p10, %p1927_p9  ;;  %p1934_p2 = por %p1933_p0, %p1932_p6 }
  0x5d   : > { %p1930_p12 = pneg %p1929_p11 }
  0x5f   : > { %p1935_p4 = pnand %p1934_p2, %p1930_p12 }
  0x61   : > { %1938 = shalt.err (!%p1935_p4)
}
  0x62   : > { %s1939_s9 = scalar_lea.vmem %s322_s22, 48  ;;  %s2070_s15 = smov [#allocation2]  }
  0x63   : > { %p1940_p1 = scmp.ne.s32.totalorder %s322_s22, %s1939_s9  ;;  %s1944_s4 = sshll.u32 %s2070_s15, 4  ;;  %s1945_s4 = int_to_ptr.vmem [resolvable:$false] %s1944_s4 }
  0x64   : > { %s1946_s3 = scalar_lea.vmem %s1945_s4, 96  ;;  %p1947_p11 = scmp.lt.s32.totalorder %s322_s22, %s1945_s4 }
  0x65   : > { %p1942_p8 = pnand %p1940_p1, %p1928_p10  ;;  %p1948_p5 = scmp.lt.s32.totalorder %s1946_s3, %s1939_s9 }
  0x67   : > { %p1943_p9 = pneg %p1942_p8  ;;  %p1949_p13 = por %p1948_p5, %p1947_p11 }
  0x69   : > { %p1950_p3 = pnand %p1949_p13, %p1943_p9 }
  0x6b   : > { %1953 = shalt.err (!%p1950_p3)
}
  0x6c   : > { %1699 = dma.hbm_to_vmem [thread:$0]  (!%p2255_p7), %s2263_s18, 48, %s322_s22, %s310_s23  }
  0x6d   : > { %s1657_s2 = smul.u32 12, %s2243_s19  ;;  %s2488_s15 = sand.u32 1, %s2062_s30  }
  0x6e   : > { %s1658_s14 = smul.u32 192, %s2062_s30  ;;  %s329_s3 = scalar_lea.sflag [#allocation6], %s2488_s15 }
  0x6f   : > { %s332_s4 = scalar_lea.vmem [#allocation5], %s1657_s2  ;;  %s1959_s22 = scalar_lea.hbm %s2462_s1, 384 }
  0x70   : > { %s2291_s17 = scalar_lea.hbm %s2462_s1, %s1658_s14  ;;  %s340_s9 = sshll.u32 %s332_s4, 4  ;;  %s341_s9 = int_to_ptr.vmem [resolvable:$true] %s340_s9 }
  0x71   : > { %s1954_s0 = scalar_lea.hbm %s2291_s17, 192  ;;  %p1960_p13 = scmp.lt.s32.totalorder %s2291_s17, %s2462_s1 }
  0x72   : > { %p1955_p1 = scmp.ne.s32.totalorder %s2291_s17, %s1954_s0  ;;  %p1961_p5 = scmp.lt.s32.totalorder %s1959_s22, %s1954_s0 }
  0x74   : > { %p1957_p3 = pnand %p1955_p1, %p1928_p10  ;;  %p1962_p8 = por %p1961_p5, %p1960_p13 }
  0x76   : > { %p1958_p4 = pneg %p1957_p3 }
  0x78   : > { %p1963_p12 = pnand %p1962_p8, %p1958_p4 }
  0x7a   : > { %1966 = shalt.err (!%p1963_p12)
}
  0x7b   : > { %s1967_s2 = scalar_lea.vmem %s341_s9, 192  ;;  %s2071_s10 = smov [#allocation5]  }
  0x7c   : > { %p1968_p6 = scmp.ne.s32.totalorder %s341_s9, %s1967_s2  ;;  %s1972_s16 = sshll.u32 %s2071_s10, 4  ;;  %s1973_s16 = int_to_ptr.vmem [resolvable:$false] %s1972_s16 }
  0x7d   : > { %s1974_s4 = scalar_lea.vmem %s1973_s16, 384  ;;  %p1975_p9 = scmp.lt.s32.totalorder %s341_s9, %s1973_s16 }
  0x7e   : > { %p1970_p0 = pnand %p1968_p6, %p1928_p10  ;;  %p1976_p11 = scmp.lt.s32.totalorder %s1974_s4, %s1967_s2 }
  0x80   : > { %p1971_p2 = pneg %p1970_p0  ;;  %p1977_p1 = por %p1976_p11, %p1975_p9 }
  0x82   : > { %p1978_p3 = pnand %p1977_p1, %p1971_p2 }
  0x84   : > { %1981 = shalt.err (!%p1978_p3)
}
  0x85   : > { %1702 = dma.hbm_to_vmem [thread:$0]  (!%p2255_p7), %s2291_s17, 192, %s341_s9, %s329_s3  }
  0x86   : > { %p2489_p4 = scmp.ne.s32.totalorder %s2478_s12, 0 }
  0x87   : > { %s2316_s0 = sand.u32 (!%p2489_p4), 1, %s2054_s28   ;;  %p2490_p10 = scmp.ne.s32.totalorder (!%p2489_p4), %s2483_s25, 0 }
  0x88   : > { %349 = sbr.rel (%p2489_p4) target bundleno = 843 (0x34b), region = 52  ;;  %s352_s19 = scalar_lea.sflag (!%p2489_p4), [#allocation3], %s2316_s0 }
  0x89   : > { %s1659_s15 = smul.u32 (!%p2489_p4), 3, %s2316_s0 }
  0x8b   : > { %s2320_s18 = scalar_lea.vmem (!%p2489_p4), [#allocation2], %s1659_s15 }
  0x8d   : > { %2025 = dma.done.wait (%p2490_p10), %s352_s19, 48  }
  0x8e   : > { %2027 = vsyncadd (%p2490_p10), %s352_s19, 4294967248  ;;  %s360_s12 = sand.u32 1, %s2141_s11   ;;  %s1660_s13 = smul.u32 12, %s2316_s0 }
  0x8f   : > { %s361_s17 = scalar_lea.sflag [#allocation6], %s360_s12 }
  0x90   : > { %s2328_s9 = scalar_lea.vmem [#allocation5], %s1660_s13 }
  0x91   : > { %2029 = dma.done.wait (%p2490_p10), %s361_s17, 192  }
  0x92   : > { %2031 = vsyncadd (%p2490_p10), %s361_s17, 4294967104  ;;  %p2491_p7 = scmp.eq.s32.totalorder %s2141_s11, 0 }
  0x94   : > { %2033 = dma.done.wait (%p2491_p7), [#allocation6], 3072   ;;  %p2492_p13 = pmov %p2491_p7 }
  0x95   : > { %p2493_p5 = pmov %p2491_p7 }
  0x96   : > { %2035 = vsyncadd (%p2492_p13), [#allocation6], 4294964224 }
  0x97   : > { %2037 = dma.done.wait (%p2493_p5), [#allocation9], 4096   ;;  %p2494_p8 = pmov %p2493_p5 }
  0x98   : > { %p2495_p12 = pmov %p2493_p5 }
  0x99   : > { %2039 = vsyncadd (%p2494_p8), [#allocation9], 4294963200 }
  0x9a   : > { %2041 = dma.done.wait (%p2495_p12), [#allocation12], 1024   ;;  %p2496_p6 = pmov %p2493_p5 }
  0x9b   : > { %v2072_v0 = vmov 0.0   ;;  %vm2073_vm0 = vmmov 0   ;;  %v1757_v1 = vld [vmem:[#allocation7 + $0x78] sm:$0xff]   ;;  %v1760_v4 = vld [vmem:[#allocation7 + $0x70] sm:$0xff]   ;;  %v1763_v7 = vld [vmem:[#allocation7 + $0x68] sm:$0xff]   ;;  %v420_v14 = vlaneseq  ;;  %s1484_s4 = sshll.u32 %s2141_s11, 4 }
  0x9c   : > { %2043 = vsyncadd (%p2496_p6), [#allocation12], 4294966272  ;;  %1569 = vmatprep.subr.bf16.mxu1 %v2072_v0  ;;  %1585 = vmatprep.mubr.msk.bf16.mxu1 %vm2073_vm0, %v2072_v0  ;;  %v1758_v2 = vld [vmem:[#allocation7 + $0x38] sm:$0xff]   ;;  %v1761_v5 = vld [vmem:[#allocation7 + $0x30] sm:$0xff]   ;;  %s416_s15 = scalar_lea.vmem [#allocation13], %s2316_s0  ;;  %vm1262_vm1 = vcmask 24576   ;;  %s2418_s13 = scalar_lea.hbm %s2469_s8, %s1484_s4 }
  0x9d   : > { %1487 = vmatprep.subr.bf16.mxu0 %v1757_v1  ;;  %v1759_v3 = vld [vmem:[#allocation7 + $0xb8] sm:$0xff]   ;;  %v1762_v6 = vld [vmem:[#allocation7 + $0xb0] sm:$0xff]   ;;  %v1764_v8 = vld [vmem:[#allocation7 + $0x28] sm:$0xff]   ;;  %v2353_v18 = vshrl.u32 %v420_v14, 7  ;;  %s1277_s19 = sshll.u32 %s416_s15, 4  ;;  %s1265_s17 = scalar_lea.sflag [#allocation4], %s2316_s0  ;;  %s2420_s19 = int_to_ptr.vmem [resolvable:$true] %s1277_s19 }
  0x9e   : > { %1488 = vmatpush3.bf16.msra.mxu0 %v1758_v2  ;;  %1570 = vmatpush3.bf16.msra.mxu1 %v1759_v3  ;;  %v1765_v9 = vld [vmem:[#allocation7 + $0xa8] sm:$0xff]   ;;  %v1766_v10 = vld [vmem:[#allocation7 + $0x60] sm:$0xff]   ;;  %v1769_v13 = vld [vmem:[#allocation7 + $0x58] sm:$0xff]   ;;  %p2497_p2 = scmp.ne.s32.totalorder %s2484_s20, 0  ;;  %s2074_s11 = smov [#allocation13]  }
  0x9f   : > { %1489 = vmatprep.subr.bf16.mxu0 %v1760_v4  ;;  %1571 = vmatprep.subr.bf16.mxu1 %v2072_v0  ;;  %v1767_v11 = vld [vmem:[#allocation7 + $0x20] sm:$0xff]   ;;  %v1770_v15 = vld [vmem:[#allocation7 + $0x18] sm:$0xff]   ;;  %v1772_v17 = vld [vmem:[#allocation7 + $0x50] sm:$0xff]   ;;  %v426_v23 = vsub.s32 1, %v2353_v18  ;;  %v422_v25 = vsub.s32 0, %v2353_v18  ;;  %v430_v27 = vsub.s32 2, %v2353_v18 }
  0xa0   : > { %v1768_v12 = vld [vmem:[#allocation7 + $0xa0] sm:$0xff]   ;;  %v1771_v16 = vld [vmem:[#allocation7 + $0x98] sm:$0xff]   ;;  %v1773_v19 = vld [vmem:[#allocation7 + $0x10] sm:$0xff]   ;;  %s1986_s25 = sshll.u32 %s2074_s11, 4  ;;  %s1987_s25 = int_to_ptr.vmem [resolvable:$false] %s1986_s25 }
  0xa1   : > { %v1774_v20 = vld [vmem:[#allocation7 + $0x90] sm:$0xff]   ;;  %v1775_v21 = vld [vmem:[#allocation7 + $0x48] sm:$0xff]   ;;  %v1778_v26 = vld [vmem:[#allocation7 + $0x40] sm:$0xff]   ;;  %s1988_s3 = scalar_lea.vmem %s1987_s25, 32  ;;  %p1989_p1 = scmp.lt.s32.totalorder %s2420_s19, %s1987_s25 }
  0xa2   : > { %1490 = vmatpush3.bf16.msra.mxu0 %v1761_v5  ;;  %1572 = vmatpush3.bf16.msra.mxu1 %v1762_v6  ;;  %v1776_v22 = vld [vmem:[#allocation7 + $0x8] sm:$0xff]   ;;  %v418_v28 = vld [vmem:[%s2320_s18] sm:$0x7]  ;;  %v1781_v35 = vld [vmem:[#allocation8 + $0x78] sm:$0xff]  }
  0xa3   : > { %1491 = vmatprep.subr.bf16.mxu0 %v1763_v7  ;;  %1573 = vmatprep.subr.bf16.mxu1 %v2072_v0  ;;  %v1777_v24 = vld [vmem:[#allocation7 + $0x88] sm:$0xff]   ;;  %v427_v29 = vrot.slane %v418_v28, %v426_v23  ;;  %v1779_v30 = vld [vmem:[#allocation7] sm:$0xff]   ;;  %v423_v31 = vrot.slane %v418_v28, %v422_v25  ;;  %v431_v34 = vrot.slane %v418_v28, %v430_v27  ;;  %v1782_v37 = vld [vmem:[#allocation8 + $0x38] sm:$0xff]  }
  0xa4   : > { %v1780_v32 = vld [vmem:[#allocation7 + $0x80] sm:$0xff]   ;;  %v1783_v39 = vld [vmem:[#allocation8 + $0xb8] sm:$0xff]   ;;  %v1784_v40 = vld [vmem:[#allocation8 + $0x70] sm:$0xff]  }
  0xa5   : > { %v436_v33 = vpack.c.bf16 %v427_v29, %v427_v29  ;;  %v435_v36 = vpack.c.bf16 %v423_v31, %v423_v31  ;;  %v437_v38 = vpack.c.bf16 %v431_v34, %v431_v34  ;;  %v1785_v41 = vld [vmem:[#allocation8 + $0x30] sm:$0xff]   ;;  %v1787_v43 = vld [vmem:[#allocation8 + $0x68] sm:$0xff]   ;;  %v1790_v46 = vld [vmem:[#allocation8 + $0x60] sm:$0xff]  }
  0xa6   : > { %1492 = vmatpush3.bf16.msra.mxu0 %v1764_v8  ;;  %1574 = vmatpush3.bf16.msra.mxu1 %v1765_v9  ;;  %v1786_v42 = vld [vmem:[#allocation8 + $0xb0] sm:$0xff]   ;;  %v1788_v44 = vld [vmem:[#allocation8 + $0x28] sm:$0xff]   ;;  %v1791_v47 = vld [vmem:[#allocation8 + $0x20] sm:$0xff]  }
  0xa7   : > { %1493 = vmatprep.subr.bf16.mxu0 %v1766_v10  ;;  %1575 = vmatprep.subr.bf16.mxu1 %v2072_v0  ;;  %v1789_v45 = vld [vmem:[#allocation8 + $0xa8] sm:$0xff]   ;;  %v1792_v48 = vld [vmem:[#allocation8 + $0xa0] sm:$0xff]   ;;  %v1793_v49 = vld [vmem:[#allocation8 + $0x58] sm:$0xff]  }
  0xa8   : > { %673 = vmatprep.mubr.bf16.mxu0 %v436_v33  ;;  %v1794_v50 = vld [vmem:[#allocation8 + $0x18] sm:$0xff]   ;;  %v1796_v52 = vld [vmem:[#allocation8 + $0x50] sm:$0xff]   ;;  %v1799_v58 = vld [vmem:[#allocation8 + $0x48] sm:$0xff]  }
  0xa9   : > { %v1795_v51 = vld [vmem:[#allocation8 + $0x98] sm:$0xff]   ;;  %v1797_v55 = vld [vmem:[#allocation8 + $0x10] sm:$0xff]   ;;  %v1800_v59 = vld [vmem:[#allocation8 + $0x8] sm:$0xff]  }
  0xaa   : > { %1494 = vmatpush3.bf16.msra.mxu0 %v1767_v11  ;;  %1576 = vmatpush3.bf16.msra.mxu1 %v1768_v12  ;;  %v438_v53 = vld [vmem:[%s2328_s9] sm:$0xff]  ;;  %v1802_v61 = vld [vmem:[#allocation8 + $0x40] sm:$0xff]   ;;  %v439_v1 = vld [vmem:[%s2328_s9 + $0x8] sm:$0xf]  ;;  %s1982_s9 = scalar_lea.vmem %s2420_s19, 16 }
  0xab   : > { %1495 = vmatprep.subr.bf16.mxu0 %v1769_v13  ;;  %1577 = vmatprep.subr.bf16.mxu1 %v2072_v0  ;;  %v441_v54 = vcombine.high %v438_v53, %v438_v53  ;;  %v1798_v56 = vld [vmem:[#allocation8 + $0x90] sm:$0xff]   ;;  %v1801_v60 = vld [vmem:[#allocation8 + $0x88] sm:$0xff]   ;;  %v1803_v62 = vld [vmem:[#allocation8] sm:$0xff]   ;;  %v443_v2 = vpack.c.bf16 %v438_v53, %v438_v53  ;;  %v445_v3 = vpack.c.bf16 %v439_v1, %v439_v1  ;;  %p1983_p0 = scmp.ne.s32.totalorder %s2420_s19, %s1982_s9  ;;  %p1990_p3 = scmp.lt.s32.totalorder %s1988_s3, %s1982_s9 }
  0xac   : > { %v1804_v63 = vld [vmem:[#allocation8 + $0x80] sm:$0xff]   ;;  %v1806_v4 = vld [vmem:[#allocation10 + $0x38] sm:$0xff]   ;;  %v1807_v5 = vld [vmem:[#allocation10 + $0x30] sm:$0xff]  }
  0xad   : > { %v444_v57 = vpack.c.bf16 %v441_v54, %v441_v54  ;;  %v1808_v6 = vld [vmem:[#allocation10 + $0x28] sm:$0xff]   ;;  %v1809_v7 = vld [vmem:[#allocation10 + $0x20] sm:$0xff]   ;;  %v1810_v8 = vld [vmem:[#allocation10 + $0x18] sm:$0xff]   ;;  %p1984_p9 = pnand %p1983_p0, %p2497_p2  ;;  %p1991_p4 = por %p1990_p3, %p1989_p1 }
  0xae   : > { %1496 = vmatpush3.bf16.msra.mxu0 %v1770_v15  ;;  %1578 = vmatpush3.bf16.msra.mxu1 %v1771_v16  ;;  %v1811_v9 = vld [vmem:[#allocation10 + $0x10] sm:$0xff]   ;;  %v1812_v10 = vld [vmem:[#allocation10 + $0x8] sm:$0xff]   ;;  %v1813_v11 = vld [vmem:[#allocation10] sm:$0xff]  }
  0xaf   : > { %1497 = vmatprep.subr.bf16.mxu0 %v1772_v17  ;;  %1579 = vmatprep.subr.bf16.mxu1 %v2072_v0  ;;  %v1814_v12 = vld [vmem:[#allocation11 + $0x38] sm:$0xff]   ;;  %v1815_v13 = vld [vmem:[#allocation11 + $0x30] sm:$0xff]   ;;  %v1816_v14 = vld [vmem:[#allocation11 + $0x28] sm:$0xff]   ;;  %p1985_p11 = pneg %p1984_p9 }
  0xb0   : > { %v1817_v15 = vld [vmem:[#allocation11 + $0x20] sm:$0xff]   ;;  %v1818_v16 = vld [vmem:[#allocation11 + $0x18] sm:$0xff]   ;;  %v1819_v17 = vld [vmem:[#allocation11 + $0x10] sm:$0xff]  }
  0xb1   : > { %v446_v23 = vld [vmem:[%s2467_s6] sm:$0x1]  ;;  %v1483_v54 = vld [vmem:[%s2467_s6 + $0x2] ss:$0 sm:$0xff]  ;;  %p1992_p10 = pnand %p1991_p4, %p1985_p11 }
  0xb2   : > { %1498 = vmatpush3.bf16.msra.mxu0 %v1773_v19  ;;  %1580 = vmatpush3.bf16.msra.mxu1 %v1774_v20  ;;  %v1820_v19 = vld [vmem:[#allocation11 + $0x8] sm:$0xff]   ;;  %v1821_v20 = vld [vmem:[#allocation11] sm:$0xff]  }
  0xb3   : > { %1499 = vmatprep.subr.bf16.mxu0 %v1775_v21  ;;  %1581 = vmatprep.subr.bf16.mxu1 %v2072_v0  ;;  %v1220_v18 = vld [vmem:[%s2468_s7] sm:$0x1] }
  0xb6   : > { %1500 = vmatpush3.bf16.msra.mxu0 %v1776_v22  ;;  %1582 = vmatpush3.bf16.msra.mxu1 %v1777_v24 }
  0xb7   : > { %1501 = vmatprep.subr.bf16.mxu0 %v1778_v26  ;;  %1583 = vmatprep.subr.bf16.mxu1 %v2072_v0 }
  0xba   : > { %1502 = vmatpush3.bf16.msra.mxu0 %v1779_v30  ;;  %1584 = vmatpush3.bf16.msra.mxu1 %v1780_v32 }
  0xbb   : > { %1518 = vmatprep.subr.bf16.mxu0 %v1781_v35  ;;  %1589 = vmatprep.subr.bf16.mxu1 %v2072_v0 }
  0xbd   : > { %674 = vmatmul.mubr.bf16.vlgmr.msra.gmra.mxu0 %v435_v36  ;;  %1586 = vmatmul.mubr.bf16.vlgmr.msra.gmra.mxu1 %v437_v38  ;;  %v1442_v38 = vld [vmem:[%s2467_s6 + $0x1] ss:$0 sm:$0xff] }
  0xbe   : > { %1519 = vmatpush3.bf16.msra.mxu0 %v1782_v37  ;;  %1590 = vmatpush3.bf16.msra.mxu1 %v1783_v39 }
  0xbf   : > { %1520 = vmatprep.subr.bf16.mxu0 %v1784_v40  ;;  %1591 = vmatprep.subr.bf16.mxu1 %v2072_v0 }
  0xc0   : > { %1605 = vmatprep.mubr.msk.bf16.mxu1 %vm2073_vm0, %v2072_v0  ;;  %950 = vmatprep.mubr.bf16.mxu0 %v444_v57 }
  0xc2   : > { %1521 = vmatpush3.bf16.msra.mxu0 %v1785_v41  ;;  %1592 = vmatpush3.bf16.msra.mxu1 %v1786_v42 }
  0xc3   : > { %1522 = vmatprep.subr.bf16.mxu0 %v1787_v43  ;;  %1593 = vmatprep.subr.bf16.mxu1 %v2072_v0 }
  0xc6   : > { %1523 = vmatpush3.bf16.msra.mxu0 %v1788_v44  ;;  %1594 = vmatpush3.bf16.msra.mxu1 %v1789_v45 }
  0xc7   : > { %1524 = vmatprep.subr.bf16.mxu0 %v1790_v46  ;;  %1595 = vmatprep.subr.bf16.mxu1 %v2072_v0 }
  0xca   : > { %1525 = vmatpush3.bf16.msra.mxu0 %v1791_v47  ;;  %1596 = vmatpush3.bf16.msra.mxu1 %v1792_v48 }
  0xcb   : > { %1526 = vmatprep.subr.bf16.mxu0 %v1793_v49  ;;  %1597 = vmatprep.subr.bf16.mxu1 %v2072_v0 }
  0xce   : > { %1527 = vmatpush3.bf16.msra.mxu0 %v1794_v50  ;;  %1598 = vmatpush3.bf16.msra.mxu1 %v1795_v51 }
  0xcf   : > { %1528 = vmatprep.subr.bf16.mxu0 %v1796_v52  ;;  %1599 = vmatprep.subr.bf16.mxu1 %v2072_v0 }
  0xd2   : > { %1529 = vmatpush3.bf16.msra.mxu0 %v1797_v55  ;;  %1600 = vmatpush3.bf16.msra.mxu1 %v1798_v56 }
  0xd3   : > { %1530 = vmatprep.subr.bf16.mxu0 %v1799_v58  ;;  %1601 = vmatprep.subr.bf16.mxu1 %v2072_v0 }
  0xd6   : > { %1531 = vmatpush3.bf16.msra.mxu0 %v1800_v59  ;;  %1602 = vmatpush3.bf16.msra.mxu1 %v1801_v60 }
  0xd7   : > { %1532 = vmatprep.subr.bf16.mxu0 %v1802_v61  ;;  %1603 = vmatprep.subr.bf16.mxu1 %v2072_v0 }
  0xda   : > { %1533 = vmatpush3.bf16.msra.mxu0 %v1803_v62  ;;  %1604 = vmatpush3.bf16.msra.mxu1 %v1804_v63 }
  0xdb   : > { %1609 = vmatprep.subr.bf16.mxu0 %v2072_v0  ;;  %1629 = vmatprep.subr.bf16.mxu1 %v2072_v0 }
  0xdd   : > { %951 = vmatmul.mubr.bf16.vlgmr.msra.gmra.mxu0 %v443_v2  ;;  %1606 = vmatmul.mubr.bf16.vlgmr.msra.gmra.mxu1 %v445_v3 }
  0xde   : > { %1610 = vmatpush3.bf16.msra.mxu0 %v1806_v4  ;;  %1625 = vmatprep.mubr.msk.bf16.mxu0 %vm2073_vm0, %v2072_v0 }
  0xdf   : > { %1611 = vmatprep.subr.bf16.mxu0 %v2072_v0  ;;  %1645 = vmatprep.mubr.msk.bf16.mxu1 %vm2073_vm0, %v2072_v0 }
  0xe0   : > { %1630 = vmatpush3.bf16.msra.mxu1 %v1814_v12 }
  0xe1   : > { %1631 = vmatprep.subr.bf16.mxu1 %v2072_v0 }
  0xe2   : > { %1612 = vmatpush3.bf16.msra.mxu0 %v1807_v5 }
  0xe3   : > { %1613 = vmatprep.subr.bf16.mxu0 %v2072_v0 }
  0xe4   : > { %1632 = vmatpush3.bf16.msra.mxu1 %v1815_v13 }
  0xe5   : > { %1633 = vmatprep.subr.bf16.mxu1 %v2072_v0 }
  0xe6   : > { %1614 = vmatpush3.bf16.msra.mxu0 %v1808_v6 }
  0xe7   : > { %1615 = vmatprep.subr.bf16.mxu0 %v2072_v0 }
  0xe8   : > { %1634 = vmatpush3.bf16.msra.mxu1 %v1816_v14 }
  0xe9   : > { %1635 = vmatprep.subr.bf16.mxu1 %v2072_v0 }
  0xea   : > { %1616 = vmatpush3.bf16.msra.mxu0 %v1809_v7 }
  0xeb   : > { %1617 = vmatprep.subr.bf16.mxu0 %v2072_v0 }
  0xec   : > { %1636 = vmatpush3.bf16.msra.mxu1 %v1817_v15 }
  0xed   : > { %1637 = vmatprep.subr.bf16.mxu1 %v2072_v0 }
  0xee   : > { %1618 = vmatpush3.bf16.msra.mxu0 %v1810_v8 }
  0xef   : > { %1619 = vmatprep.subr.bf16.mxu0 %v2072_v0 }
  0xf0   : > { %1638 = vmatpush3.bf16.msra.mxu1 %v1818_v16 }
  0xf1   : > { %1639 = vmatprep.subr.bf16.mxu1 %v2072_v0 }
  0xf2   : > { %1620 = vmatpush3.bf16.msra.mxu0 %v1811_v9 }
  0xf3   : > { %1621 = vmatprep.subr.bf16.mxu0 %v2072_v0 }
  0xf4   : > { %1640 = vmatpush3.bf16.msra.mxu1 %v1819_v17 }
  0xf5   : > { %1641 = vmatprep.subr.bf16.mxu1 %v2072_v0 }
  0xf6   : > { %1622 = vmatpush3.bf16.msra.mxu0 %v1812_v10 }
  0xf7   : > { %1623 = vmatprep.subr.bf16.mxu0 %v2072_v0 }
  0xf8   : > { %1642 = vmatpush3.bf16.msra.mxu1 %v1820_v19 }
  0xf9   : > { %1643 = vmatprep.subr.bf16.mxu1 %v2072_v0 }
  0xfa   : > { %1624 = vmatpush3.bf16.msra.mxu0 %v1813_v11 }
  0xfb   : > { %1649 = vmatprep.subr.bf16.mxu0 %v2072_v0 }
  0xfc   : > { %1644 = vmatpush3.bf16.msra.mxu1 %v1821_v20 }
 0x17d   : > { %v1503_v21 = vpop.f32.mrf.mxu0  ;;  %v715_v22 = vpop.f32.mrf.mxu1 }
 0x17f   : > { %v1504_v24 = vpop.f32.mrf.mxu0  ;;  %v1587_v27 = vpop.f32.mrf.mxu1 }
 0x180   : > { %v1505_v26 = vadd.f32 %v1504_v24, %v1503_v21 }
 0x181   : > { %v1506_v28 = vpop.f32.mrf.mxu0  ;;  %v718_v30 = vpop.f32.mrf.mxu1 }
 0x182   : > { %v676_v29 = vadd.f32 %v1505_v26, %v446_v23 }
 0x183   : > { %v1507_v31 = vpop.f32.mrf.mxu0  ;;  %v1588_v33 = vpop.f32.mrf.mxu1 }
 0x184   : > { %v716_v32 = vadd.f32 %v715_v22, %v676_v29 }
 0x186   : > { %v721_v34 = vmax.f32 %v716_v32, 0.0 }
 0x188   : > { %v999_v35 = vpack.c.bf16 %v721_v34, %v721_v34 }
 0x18a   : > { %1626 = vmatmul.mubr.bf16.vlgmr.msra.gmra.mxu0 %v999_v35 }
 0x18b   : > { %1651 = vmatprep.mubr.msk.bf16.mxu0 %vm2073_vm0, %v2072_v0 }
 0x19d   : > { %v1534_v36 = vpop.f32.mrf.mxu0  ;;  %v992_v37 = vpop.f32.mrf.mxu1 }
 0x19f   : > { %v1535_v39 = vpop.f32.mrf.mxu0  ;;  %v1607_v41 = vpop.f32.mrf.mxu1 }
 0x1a0   : > { %v1536_v40 = vadd.f32 %v1535_v39, %v1534_v36 }
 0x1a1   : > { %v1537_v42 = vpop.f32.mrf.mxu0  ;;  %v995_v44 = vpop.f32.mrf.mxu1 }
 0x1a2   : > { %v953_v43 = vadd.f32 %v1536_v40, %v1442_v38 }
 0x1a3   : > { %v1538_v45 = vpop.f32.mrf.mxu0  ;;  %v1608_v47 = vpop.f32.mrf.mxu1 }
 0x1a4   : > { %v993_v46 = vadd.f32 %v992_v37, %v953_v43 }
 0x1a6   : > { %v998_v48 = vmax.f32 %v993_v46, 0.0 }
 0x1a8   : > { %v1104_v49 = vpack.c.bf16 %v998_v48, %v998_v48 }
 0x1aa   : > { %1646 = vmatmul.mubr.bf16.vlgmr.msra.gmra.mxu1 %v1104_v49 }
 0x24a   : > { %v1098_v50 = vpop.f32.mrf.mxu0 }
 0x24b   : > { %v1212_v53 = vrot.slane %v1098_v50, %v422_v25 }
 0x24c   : > { %v1627_v0 = vpop.f32.mrf.mxu0 }
 0x24e   : > { %v1101_v51 = vpop.f32.mrf.mxu0 }
 0x250   : > { %v1628_v52 = vpop.f32.mrf.mxu0 }
 0x26a   : > { %v1203_v55 = vpop.f32.mrf.mxu1 }
 0x26b   : > { %v1213_v56 = vadd.f32 %v1212_v53, %v1203_v55 }
 0x26c   : > { %v1647_v57 = vpop.f32.mrf.mxu1 }
 0x26d   : > { %v1218_v58 = vadd.f32 %v1483_v54, %v1213_v56 }
 0x26e   : > { %v1206_v59 = vpop.f32.mrf.mxu1 }
 0x26f   : > { %v1219_v60 = vmax.f32 %v1218_v58, 0.0 }
 0x270   : > { %v1648_v61 = vpop.f32.mrf.mxu1 }
 0x271   : > { %v1221_v62 = vpack.c.bf16 %v1219_v60, %v1219_v60 }
 0x273   : > { %1650 = vmatpush3.bf16.xpose.msra.mxu0 %v1221_v62 }
 0x27a   : > { %1652 = vmatmul.mubr.bf16.vlgmr.msra.gmra.mxu0 %v1220_v18 }
 0x33a   : > { %v1256_v25 = vpop.f32.mrf.mxu0 }
 0x33b   : > { %1263 = vst.msk [vmem:[%s416_s15] sm:$0x1] %vm1262_vm1, %v1256_v25 }
 0x33c   : > { %v1653_v63 = vpop.f32.mrf.mxu0 }
 0x33d   : > { %1995 = shalt.err (!%p1992_p10)
}
 0x33e   : > { %s1996_s22 = scalar_lea.hbm %s2418_s13, 16  ;;  %s2000_s14 = scalar_lea.hbm %s2469_s8, 32 }
 0x33f   : > { %p1997_p7 = scmp.ne.s32.totalorder %s2418_s13, %s1996_s22  ;;  %p2001_p8 = scmp.lt.s32.totalorder %s2418_s13, %s2469_s8 }
 0x340   : > { %p2002_p12 = scmp.lt.s32.totalorder %s2000_s14, %s1996_s22 }
 0x341   : > { %p1998_p13 = pnand %p1997_p7, %p2497_p2 }
 0x342   : > { %p2003_p6 = por %p2002_p12, %p2001_p8 }
 0x343   : > { %p1999_p5 = pneg %p1998_p13 }
 0x345   : > { %p2004_p0 = pnand %p2003_p6, %p1999_p5 }
 0x347   : > { %2007 = shalt.err (!%p2004_p0)
}
 0x348   : > { %1681 = dma.vmem_to_hbm [thread:$0]  (%p2497_p2), %s2420_s19, 16, %s2418_s13, %s1265_s17   ;;  %v1259_v1 = vpop.f32.mrf.mxu0 }
 0x34a   : > { %v1654_v2 = vpop.f32.mrf.mxu0 }
 0x34b PF: > { %s1289_s16 = sand.u32 1, %s2050_s27   ;;  %p2498_p9 = scmp.ne.s32.totalorder %s2485_s26, 0 }
 0x34c   : > { %p2499_p11 = scmp.ge.s32.totalorder %s2062_s30, 2  ;;  %s1290_s4 = scalar_lea.sflag [#allocation4], %s1289_s16 }
 0x34e   : > { %p1704_p1 = pnand %p2499_p11, %p2498_p9 }
 0x350   : > { %p1705_p3 = pneg %p1704_p1 }
 0x352   : > { %2045 = dma.done.wait (%p1705_p3), %s1290_s4, 16  }
 0x353   : > { %2047 = vsyncadd (%p1705_p3), %s1290_s4, 4294967280  ;;  %p26_p2 = scmp.ge.s32.totalorder %s2221_s21, 4   ;;  %s2500_s27 = smov %s2054_s28 }
 0x354   : > { %s2501_s28 = smov %s2058_s29  ;;  %s2502_s29 = smov %s2232_s24 }
 0x355   : > { %s2503_s30 = smov %s2221_s21  ;;  %28 = sbr.rel (!%p26_p2) target bundleno = 14 (0xe), region = 126 }
 0x35a   :  { %1294 = vsyncpa [#allocation3], 1 }
 0x35b   :  { %1296 = vsyncpa [#allocation3 + $0x1], 1 }
 0x35c   :  { %1297 = vsyncpa [#allocation6], 1 }
 0x35d   :  { %1299 = vsyncpa [#allocation6 + $0x1], 1 }
 0x35e   :  { %1300 = vsyncpa [#allocation9], 1 }
 0x35f   :  { %1301 = vsyncpa [#allocation12], 1 }
 0x360   :  { %1302 = vsyncpa [#allocation4], 1 }
 0x361   :  { %1304 = vsyncpa [#allocation4 + $0x1], 1 }

// kernel: tpu_custom_call.1
= control target key start
LH: loop header
LB: loop body
LE: loop exit
PB: predicated region body
PF: predicated region fallthrough
CT: control target
= control target key end

     0   :  { %s2461_s0 = inlined_call_operand.hbm [shape: f32[2,1,384], index: 0, kind: input, shape index: {}]   ;;  %s2462_s1 = inlined_call_operand.hbm [shape: f32[2,4,384], index: 1, kind: input, shape index: {}]   ;;  %s2463_s2 = inlined_call_operand.hbm [shape: bf16[384,128], index: 2, kind: input, shape index: {}]   ;;  %s2464_s3 = inlined_call_operand.hbm [shape: bf16[384,128], index: 3, kind: input, shape index: {}]   ;;  %s2465_s4 = inlined_call_operand.hbm [shape: bf16[128,128], index: 4, kind: input, shape index: {}]   ;;  %s2466_s5 = inlined_call_operand.hbm [shape: bf16[128,128], index: 5, kind: input, shape index: {}]   ;;  %s2467_s6 = inlined_call_operand.vmem [shape: f32[3,128], index: 6, kind: input, shape index: {}]   ;;  %s2468_s7 = inlined_call_operand.vmem [shape: bf16[1,128], index: 7, kind: input, shape index: {}]   ;;  %s2469_s8 = inlined_call_operand.hbm [shape: f32[2,1,4], index: 8, kind: output, shape index: {}]  }
   0x1   :  { %2474 = sst [smem:[#allocation20_spill]] %s2461_s0 }
   0x2   :  { %2475 = sst [smem:[#allocation21_spill]] %s2463_s2 }
   0x3   :  { %2476 = sst [smem:[#allocation22_spill]] %s2464_s3 }
   0x4   :  { %2477 = sst [smem:[#allocation23_spill]] %s2465_s4 }
   0x5   :  { %13 = vsyncpa [#allocation3], 0 }
   0x6   :  { %15 = vsyncpa [#allocation3 + $0x1], 0 }
   0x7   :  { %16 = vsyncpa [#allocation6], 0 }
   0x8   :  { %18 = vsyncpa [#allocation6 + $0x1], 0 }
   0x9   :  { %19 = vsyncpa [#allocation9], 0 }
   0xa   :  { %20 = vsyncpa [#allocation12], 0 }
   0xb   :  { %21 = vsyncpa [#allocation4], 0 }
   0xc   :  { %23 = vsyncpa [#allocation4 + $0x1], 0  ;;  %s2120_s27 = smov 0   ;;  %s2122_s28 = smov 0  }
   0xd   :  { %s2124_s29 = smov 0   ;;  %s2126_s30 = smov 0  }
   0xe LB: > { %s2064_s9 = smov [#allocation7]   ;;  %s2141_s11 = sadd.s32 4294967295, %s2062_s30   ;;  %s2062_s30 = sphi %s2126_s30, %s2503_s30   ;;  %s2058_s29 = sphi %s2124_s29, %s2502_s29   ;;  %s2054_s28 = sphi %s2122_s28, %s2501_s28   ;;  %s2050_s27 = sphi %s2120_s27, %s2500_s27  }
   0xf   : > { %s250_s10 = sshll.u32 %s2064_s9, 4  ;;  %p1405_p0 = scmp.ge.s32.totalorder %s2062_s30, 1  ;;  %s251_s10 = int_to_ptr.vmem [resolvable:$true] %s250_s10 }
  0x10   : > { %p2470_p1 = scmp.eq.s32.totalorder %s2141_s11, 0  ;;  %p238_p2 = scmp.lt.s32.totalorder %s2062_s30, 3 }
  0x11   : > { %s2065_s13 = smov [#allocation8]   ;;  %s2066_s16 = smov [#allocation10]  }
  0x12   : > { %p2146_p3 = pnand %p1405_p0, %p238_p2  ;;  %s263_s14 = sshll.u32 %s2065_s13, 4  ;;  %s2159_s14 = int_to_ptr.vmem [resolvable:$true] %s263_s14 }
  0x13   : > { %s276_s17 = sshll.u32 %s2066_s16, 4  ;;  %s1833_s18 = scalar_lea.vmem %s251_s10, 3072  ;;  %s2161_s17 = int_to_ptr.vmem [resolvable:$true] %s276_s17 }
  0x14   : > { %s2478_s12 = scalar_select %p2146_p3, 1, 0 }
  0x15   : > { %p1683_p5 = pneg %p2146_p3  ;;  %p1834_p8 = scmp.ne.s32.totalorder %s251_s10, %s1833_s18 }
  0x16   : > { %p1841_p11 = scmp.lt.s32.totalorder %s251_s10, %s251_s10  ;;  %p1842_p12 = scmp.lt.s32.totalorder %s1833_s18, %s1833_s18 }
  0x17   : > { %p2155_p6 = pnand %p1683_p5, %p2470_p1 }
  0x18   : > { %p1843_p13 = por %p1842_p12, %p1841_p11 }
  0x19   : > { %p1824_p7 = pneg %p2155_p6 }
  0x1b   : > { %p1836_p9 = pnand %p1834_p8, %p1824_p7 }
  0x1d   : > { %p1837_p10 = pneg %p1836_p9 }
  0x1f   : > { %p1844_p0 = pnand %p1843_p13, %p1837_p10 }
  0x21   : > { %1847 = shalt.err (!%p1844_p0)
}
  0x22   : > { %s2067_s19 = smov 64   ;;  %s2068_s20 = smov 4  }
  0x23   : > { %s2480_s2 = sld [smem:[#allocation21_spill]]  ;;  %s1859_s23 = scalar_lea.vmem %s2159_s14, 3072 }
  0x24   : > { %p1860_p2 = scmp.ne.s32.totalorder %s2159_s14, %s1859_s23  ;;  %p1867_p9 = scmp.lt.s32.totalorder %s2159_s14, %s2159_s14 }
  0x25   : > { %p1868_p10 = scmp.lt.s32.totalorder %s1859_s23, %s1859_s23 }
  0x26   : > { %p1862_p5 = pnand %p1860_p2, %p1824_p7 }
  0x27   : > { %p1869_p11 = por %p1868_p10, %p1867_p9 }
  0x28   : > { %p1863_p8 = pneg %p1862_p5 }
  0x29   : > { %1686 = dma.hbm_to_vmem [thread:$0]  (!%p2155_p6), %s2480_s2, 3072, %s251_s10, [#allocation6], %s2067_s19, %s2067_s19, %s2068_s20  }
  0x2a   : > { %p1870_p12 = pnand %p1869_p11, %p1863_p8 }
  0x2c   : > { %1873 = shalt.err (!%p1870_p12)
}
  0x2d   : > { %s2481_s3 = sld [smem:[#allocation22_spill]]  ;;  %s1885_s26 = scalar_lea.vmem %s2161_s17, 1024 }
  0x2e   : > { %p1886_p13 = scmp.ne.s32.totalorder %s2161_s17, %s1885_s26  ;;  %p1893_p5 = scmp.lt.s32.totalorder %s2161_s17, %s2161_s17 }
  0x2f   : > { %p1894_p8 = scmp.lt.s32.totalorder %s1885_s26, %s1885_s26 }
  0x30   : > { %p1888_p0 = pnand %p1886_p13, %p1824_p7 }
  0x31   : > { %p1895_p9 = por %p1894_p8, %p1893_p5 }
  0x32   : > { %p1889_p2 = pneg %p1888_p0 }
  0x33   : > { %1689 = dma.hbm_to_vmem [thread:$0]  (!%p2155_p6), %s2481_s3, 3072, %s2159_s14, [#allocation9], %s2067_s19, %s2067_s19, %s2068_s20  }
  0x34   : > { %p1896_p10 = pnand %p1895_p9, %p1889_p2 }
  0x36   : > { %1899 = shalt.err (!%p1896_p10)
}
  0x37   : > { %s2482_s4 = sld [smem:[#allocation23_spill]]  ;;  %s2069_s13 = smov [#allocation11]  }
  0x38   : > { %s289_s14 = sshll.u32 %s2069_s13, 4  ;;  %s290_s14 = int_to_ptr.vmem [resolvable:$true] %s289_s14 }
  0x39   : > { %s1911_s16 = scalar_lea.vmem %s290_s14, 1024  ;;  %p1919_p0 = scmp.lt.s32.totalorder %s290_s14, %s290_s14 }
  0x3a   : > { %p1912_p11 = scmp.ne.s32.totalorder %s290_s14, %s1911_s16  ;;  %p1920_p2 = scmp.lt.s32.totalorder %s1911_s16, %s1911_s16 }
  0x3c   : > { %p1914_p12 = pnand %p1912_p11, %p1824_p7  ;;  %p1921_p5 = por %p1920_p2, %p1919_p0 }
  0x3d   : > { %1692 = dma.hbm_to_vmem [thread:$0]  (!%p2155_p6), %s2482_s4, 1024, %s2161_s17, [#allocation9], %s2067_s19, %s2067_s19, %s2068_s20  }
  0x3e   : > { %p1915_p13 = pneg %p1914_p12 }
  0x40   : > { %p1922_p8 = pnand %p1921_p5, %p1915_p13 }
  0x42   : > { %1925 = shalt.err (!%p1922_p8)
}
  0x43   : > { %1695 = dma.hbm_to_vmem [thread:$0]  (!%p2155_p6), %s2466_s5, 1024, %s290_s14, [#allocation12], %s2067_s19, %s2067_s19, %s2068_s20  }
  0x44   : > { %s1404_s15 = sadd.s32 4294967294, %s2062_s30   ;;  %s2221_s21 = sadd.s32 1, %s2062_s30  }
  0x45   : > { %s33_s22 = ssub.s32 %s2062_s30, %s2221_s21  ;;  %s36_s23 = sadd.s32 1, %s2058_s29 }
  0x46   : > { %p34_p7 = scmp.eq.s32.totalorder %s33_s22, 0  ;;  %p43_p9 = scmp.ne.s32.totalorder %s2058_s29, %s2054_s28 }
  0x47   : > { %p44_p10 = scmp.eq.s32.totalorder %s2062_s30, 0  ;;  %p49_p11 = scmp.ne.s32.totalorder %s2054_s28, %s2050_s27 }
  0x48   : > { %s2232_s24 = scalar_select %p34_p7, %s2058_s29, %s36_s23  }
  0x49   : > { %p45_p12 = por %p44_p10, %p43_p9  ;;  %p2236_p13 = por %p2470_p1, %p49_p11 }
  0x4a   : > { %p225_p6 = scmp.eq.s32.totalorder %s2141_s11, 1  ;;  %p231_p0 = scmp.eq.s32.totalorder %s1404_s15, 1 }
  0x4b   : > { %s2483_s25 = scalar_select %p2236_p13, 1, 0 }
  0x4c   : > { %p1711_p2 = scmp.lt.s32.totalorder %s2062_s30, 2  ;;  %s2243_s19 = sand.u32 1, %s2058_s29  }
  0x4d   : > { %p2245_p5 = por %p225_p6, %p43_p9  ;;  %p2249_p8 = por %p231_p0, %p49_p11 }
  0x4e   : > { %s1655_s9 = smul.u32 3, %s2243_s19  ;;  %p2255_p7 = pnand %p1711_p2, %p45_p12 }
  0x4f   : > { %s2484_s20 = scalar_select %p2245_p5, 1, 0 }
  0x50   : > { %s2485_s26 = scalar_select %p2249_p8, 1, 0 }
  0x51   : > { %s1656_s10 = smul.u32 48, %s2062_s30  ;;  %s2487_s0 = sld [smem:[#allocation20_spill]] }
  0x52   : > { %s313_s15 = scalar_lea.vmem [#allocation2], %s1655_s9  ;;  %s310_s23 = scalar_lea.sflag [#allocation3], %s2243_s19 }
  0x53   : > { %s321_s22 = sshll.u32 %s313_s15, 4  ;;  %p1928_p10 = pneg %p2255_p7  ;;  %s322_s22 = int_to_ptr.vmem [resolvable:$true] %s321_s22 }
  0x57   : > { %s2263_s18 = scalar_lea.hbm %s2487_s0, %s1656_s10  ;;  %s1931_s10 = scalar_lea.hbm %s2487_s0, 96 }
  0x58   : > { %s1926_s2 = scalar_lea.hbm %s2263_s18, 48  ;;  %p1932_p6 = scmp.lt.s32.totalorder %s2263_s18, %s2487_s0 }
  0x59   : > { %p1927_p9 = scmp.ne.s32.totalorder %s2263_s18, %s1926_s2  ;;  %p1933_p0 = scmp.lt.s32.totalorder %s1931_s10, %s1926_s2 }
  0x5b   : > { %p1929_p11 = pnand %p1928_p10, %p1927_p9  ;;  %p1934_p2 = por %p1933_p0, %p1932_p6 }
  0x5d   : > { %p1930_p12 = pneg %p1929_p11 }
  0x5f   : > { %p1935_p4 = pnand %p1934_p2, %p1930_p12 }
  0x61   : > { %1938 = shalt.err (!%p1935_p4)
}
  0x62   : > { %s1939_s9 = scalar_lea.vmem %s322_s22, 48  ;;  %s2070_s15 = smov [#allocation2]  }
  0x63   : > { %p1940_p1 = scmp.ne.s32.totalorder %s322_s22, %s1939_s9  ;;  %s1944_s4 = sshll.u32 %s2070_s15, 4  ;;  %s1945_s4 = int_to_ptr.vmem [resolvable:$false] %s1944_s4 }
  0x64   : > { %s1946_s3 = scalar_lea.vmem %s1945_s4, 96  ;;  %p1947_p11 = scmp.lt.s32.totalorder %s322_s22, %s1945_s4 }
  0x65   : > { %p1942_p8 = pnand %p1940_p1, %p1928_p10  ;;  %p1948_p5 = scmp.lt.s32.totalorder %s1946_s3, %s1939_s9 }
  0x67   : > { %p1943_p9 = pneg %p1942_p8  ;;  %p1949_p13 = por %p1948_p5, %p1947_p11 }
  0x69   : > { %p1950_p3 = pnand %p1949_p13, %p1943_p9 }
  0x6b   : > { %1953 = shalt.err (!%p1950_p3)
}
  0x6c   : > { %1699 = dma.hbm_to_vmem [thread:$0]  (!%p2255_p7), %s2263_s18, 48, %s322_s22, %s310_s23  }
  0x6d   : > { %s1657_s2 = smul.u32 12, %s2243_s19  ;;  %s2488_s15 = sand.u32 1, %s2062_s30  }
  0x6e   : > { %s1658_s14 = smul.u32 192, %s2062_s30  ;;  %s329_s3 = scalar_lea.sflag [#allocation6], %s2488_s15 }
  0x6f   : > { %s332_s4 = scalar_lea.vmem [#allocation5], %s1657_s2  ;;  %s1959_s22 = scalar_lea.hbm %s2462_s1, 384 }
  0x70   : > { %s2291_s17 = scalar_lea.hbm %s2462_s1, %s1658_s14  ;;  %s340_s9 = sshll.u32 %s332_s4, 4  ;;  %s341_s9 = int_to_ptr.vmem [resolvable:$true] %s340_s9 }
  0x71   : > { %s1954_s0 = scalar_lea.hbm %s2291_s17, 192  ;;  %p1960_p13 = scmp.lt.s32.totalorder %s2291_s17, %s2462_s1 }
  0x72   : > { %p1955_p1 = scmp.ne.s32.totalorder %s2291_s17, %s1954_s0  ;;  %p1961_p5 = scmp.lt.s32.totalorder %s1959_s22, %s1954_s0 }
  0x74   : > { %p1957_p3 = pnand %p1955_p1, %p1928_p10  ;;  %p1962_p8 = por %p1961_p5, %p1960_p13 }
  0x76   : > { %p1958_p4 = pneg %p1957_p3 }
  0x78   : > { %p1963_p12 = pnand %p1962_p8, %p1958_p4 }
  0x7a   : > { %1966 = shalt.err (!%p1963_p12)
}
  0x7b   : > { %s1967_s2 = scalar_lea.vmem %s341_s9, 192  ;;  %s2071_s10 = smov [#allocation5]  }
  0x7c   : > { %p1968_p6 = scmp.ne.s32.totalorder %s341_s9, %s1967_s2  ;;  %s1972_s16 = sshll.u32 %s2071_s10, 4  ;;  %s1973_s16 = int_to_ptr.vmem [resolvable:$false] %s1972_s16 }
  0x7d   : > { %s1974_s4 = scalar_lea.vmem %s1973_s16, 384  ;;  %p1975_p9 = scmp.lt.s32.totalorder %s341_s9, %s1973_s16 }
  0x7e   : > { %p1970_p0 = pnand %p1968_p6, %p1928_p10  ;;  %p1976_p11 = scmp.lt.s32.totalorder %s1974_s4, %s1967_s2 }
  0x80   : > { %p1971_p2 = pneg %p1970_p0  ;;  %p1977_p1 = por %p1976_p11, %p1975_p9 }
  0x82   : > { %p1978_p3 = pnand %p1977_p1, %p1971_p2 }
  0x84   : > { %1981 = shalt.err (!%p1978_p3)
}
  0x85   : > { %1702 = dma.hbm_to_vmem [thread:$0]  (!%p2255_p7), %s2291_s17, 192, %s341_s9, %s329_s3  }
  0x86   : > { %p2489_p4 = scmp.ne.s32.totalorder %s2478_s12, 0 }
  0x87   : > { %s2316_s0 = sand.u32 (!%p2489_p4), 1, %s2054_s28   ;;  %p2490_p10 = scmp.ne.s32.totalorder (!%p2489_p4), %s2483_s25, 0 }
  0x88   : > { %349 = sbr.rel (%p2489_p4) target bundleno = 843 (0x34b), region = 52  ;;  %s352_s19 = scalar_lea.sflag (!%p2489_p4), [#allocation3], %s2316_s0 }
  0x89   : > { %s1659_s15 = smul.u32 (!%p2489_p4), 3, %s2316_s0 }
  0x8b   : > { %s2320_s18 = scalar_lea.vmem (!%p2489_p4), [#allocation2], %s1659_s15 }
  0x8d   : > { %2025 = dma.done.wait (%p2490_p10), %s352_s19, 48  }
  0x8e   : > { %2027 = vsyncadd (%p2490_p10), %s352_s19, 4294967248  ;;  %s360_s12 = sand.u32 1, %s2141_s11   ;;  %s1660_s13 = smul.u32 12, %s2316_s0 }
  0x8f   : > { %s361_s17 = scalar_lea.sflag [#allocation6], %s360_s12 }
  0x90   : > { %s2328_s9 = scalar_lea.vmem [#allocation5], %s1660_s13 }
  0x91   : > { %2029 = dma.done.wait (%p2490_p10), %s361_s17, 192  }
  0x92   : > { %2031 = vsyncadd (%p2490_p10), %s361_s17, 4294967104  ;;  %p2491_p7 = scmp.eq.s32.totalorder %s2141_s11, 0 }
  0x94   : > { %2033 = dma.done.wait (%p2491_p7), [#allocation6], 3072   ;;  %p2492_p13 = pmov %p2491_p7 }
  0x95   : > { %p2493_p5 = pmov %p2491_p7 }
  0x96   : > { %2035 = vsyncadd (%p2492_p13), [#allocation6], 4294964224 }
  0x97   : > { %2037 = dma.done.wait (%p2493_p5), [#allocation9], 4096   ;;  %p2494_p8 = pmov %p2493_p5 }
  0x98   : > { %p2495_p12 = pmov %p2493_p5 }
  0x99   : > { %2039 = vsyncadd (%p2494_p8), [#allocation9], 4294963200 }
  0x9a   : > { %2041 = dma.done.wait (%p2495_p12), [#allocation12], 1024   ;;  %p2496_p6 = pmov %p2493_p5 }
  0x9b   : > { %v2072_v0 = vmov 0.0   ;;  %vm2073_vm0 = vmmov 0   ;;  %v1757_v1 = vld [vmem:[#allocation7 + $0x78] sm:$0xff]   ;;  %v1760_v4 = vld [vmem:[#allocation7 + $0x70] sm:$0xff]   ;;  %v1763_v7 = vld [vmem:[#allocation7 + $0x68] sm:$0xff]   ;;  %v420_v14 = vlaneseq  ;;  %s1484_s4 = sshll.u32 %s2141_s11, 4 }
  0x9c   : > { %2043 = vsyncadd (%p2496_p6), [#allocation12], 4294966272  ;;  %1569 = vmatprep.subr.bf16.mxu1 %v2072_v0  ;;  %1585 = vmatprep.mubr.msk.bf16.mxu1 %vm2073_vm0, %v2072_v0  ;;  %v1758_v2 = vld [vmem:[#allocation7 + $0x38] sm:$0xff]   ;;  %v1761_v5 = vld [vmem:[#allocation7 + $0x30] sm:$0xff]   ;;  %s416_s15 = scalar_lea.vmem [#allocation13], %s2316_s0  ;;  %vm1262_vm1 = vcmask 24576   ;;  %s2418_s13 = scalar_lea.hbm %s2469_s8, %s1484_s4 }
  0x9d   : > { %1487 = vmatprep.subr.bf16.mxu0 %v1757_v1  ;;  %v1759_v3 = vld [vmem:[#allocation7 + $0xb8] sm:$0xff]   ;;  %v1762_v6 = vld [vmem:[#allocation7 + $0xb0] sm:$0xff]   ;;  %v1764_v8 = vld [vmem:[#allocation7 + $0x28] sm:$0xff]   ;;  %v2353_v18 = vshrl.u32 %v420_v14, 7  ;;  %s1277_s19 = sshll.u32 %s416_s15, 4  ;;  %s1265_s17 = scalar_lea.sflag [#allocation4], %s2316_s0  ;;  %s2420_s19 = int_to_ptr.vmem [resolvable:$true] %s1277_s19 }
  0x9e   : > { %1488 = vmatpush3.bf16.msra.mxu0 %v1758_v2  ;;  %1570 = vmatpush3.bf16.msra.mxu1 %v1759_v3  ;;  %v1765_v9 = vld [vmem:[#allocation7 + $0xa8] sm:$0xff]   ;;  %v1766_v10 = vld [vmem:[#allocation7 + $0x60] sm:$0xff]   ;;  %v1769_v13 = vld [vmem:[#allocation7 + $0x58] sm:$0xff]   ;;  %p2497_p2 = scmp.ne.s32.totalorder %s2484_s20, 0  ;;  %s2074_s11 = smov [#allocation13]  }
  0x9f   : > { %1489 = vmatprep.subr.bf16.mxu0 %v1760_v4  ;;  %1571 = vmatprep.subr.bf16.mxu1 %v2072_v0  ;;  %v1767_v11 = vld [vmem:[#allocation7 + $0x20] sm:$0xff]   ;;  %v1770_v15 = vld [vmem:[#allocation7 + $0x18] sm:$0xff]   ;;  %v1772_v17 = vld [vmem:[#allocation7 + $0x50] sm:$0xff]   ;;  %v426_v23 = vsub.s32 1, %v2353_v18  ;;  %v422_v25 = vsub.s32 0, %v2353_v18  ;;  %v430_v27 = vsub.s32 2, %v2353_v18 }
  0xa0   : > { %v1768_v12 = vld [vmem:[#allocation7 + $0xa0] sm:$0xff]   ;;  %v1771_v16 = vld [vmem:[#allocation7 + $0x98] sm:$0xff]   ;;  %v1773_v19 = vld [vmem:[#allocation7 + $0x10] sm:$0xff]   ;;  %s1986_s25 = sshll.u32 %s2074_s11, 4  ;;  %s1987_s25 = int_to_ptr.vmem [resolvable:$false] %s1986_s25 }
  0xa1   : > { %v1774_v20 = vld [vmem:[#allocation7 + $0x90] sm:$0xff]   ;;  %v1775_v21 = vld [vmem:[#allocation7 + $0x48] sm:$0xff]   ;;  %v1778_v26 = vld [vmem:[#allocation7 + $0x40] sm:$0xff]   ;;  %s1988_s3 = scalar_lea.vmem %s1987_s25, 32  ;;  %p1989_p1 = scmp.lt.s32.totalorder %s2420_s19, %s1987_s25 }
  0xa2   : > { %1490 = vmatpush3.bf16.msra.mxu0 %v1761_v5  ;;  %1572 = vmatpush3.bf16.msra.mxu1 %v1762_v6  ;;  %v1776_v22 = vld [vmem:[#allocation7 + $0x8] sm:$0xff]   ;;  %v418_v28 = vld [vmem:[%s2320_s18] sm:$0x7]  ;;  %v1781_v35 = vld [vmem:[#allocation8 + $0x78] sm:$0xff]  }
  0xa3   : > { %1491 = vmatprep.subr.bf16.mxu0 %v1763_v7  ;;  %1573 = vmatprep.subr.bf16.mxu1 %v2072_v0  ;;  %v1777_v24 = vld [vmem:[#allocation7 + $0x88] sm:$0xff]   ;;  %v427_v29 = vrot.slane %v418_v28, %v426_v23  ;;  %v1779_v30 = vld [vmem:[#allocation7] sm:$0xff]   ;;  %v423_v31 = vrot.slane %v418_v28, %v422_v25  ;;  %v431_v34 = vrot.slane %v418_v28, %v430_v27  ;;  %v1782_v37 = vld [vmem:[#allocation8 + $0x38] sm:$0xff]  }
  0xa4   : > { %v1780_v32 = vld [vmem:[#allocation7 + $0x80] sm:$0xff]   ;;  %v1783_v39 = vld [vmem:[#allocation8 + $0xb8] sm:$0xff]   ;;  %v1784_v40 = vld [vmem:[#allocation8 + $0x70] sm:$0xff]  }
  0xa5   : > { %v436_v33 = vpack.c.bf16 %v427_v29, %v427_v29  ;;  %v435_v36 = vpack.c.bf16 %v423_v31, %v423_v31  ;;  %v437_v38 = vpack.c.bf16 %v431_v34, %v431_v34  ;;  %v1785_v41 = vld [vmem:[#allocation8 + $0x30] sm:$0xff]   ;;  %v1787_v43 = vld [vmem:[#allocation8 + $0x68] sm:$0xff]   ;;  %v1790_v46 = vld [vmem:[#allocation8 + $0x60] sm:$0xff]  }
  0xa6   : > { %1492 = vmatpush3.bf16.msra.mxu0 %v1764_v8  ;;  %1574 = vmatpush3.bf16.msra.mxu1 %v1765_v9  ;;  %v1786_v42 = vld [vmem:[#allocation8 + $0xb0] sm:$0xff]   ;;  %v1788_v44 = vld [vmem:[#allocation8 + $0x28] sm:$0xff]   ;;  %v1791_v47 = vld [vmem:[#allocation8 + $0x20] sm:$0xff]  }
  0xa7   : > { %1493 = vmatprep.subr.bf16.mxu0 %v1766_v10  ;;  %1575 = vmatprep.subr.bf16.mxu1 %v2072_v0  ;;  %v1789_v45 = vld [vmem:[#allocation8 + $0xa8] sm:$0xff]   ;;  %v1792_v48 = vld [vmem:[#allocation8 + $0xa0] sm:$0xff]   ;;  %v1793_v49 = vld [vmem:[#allocation8 + $0x58] sm:$0xff]  }
  0xa8   : > { %673 = vmatprep.mubr.bf16.mxu0 %v436_v33  ;;  %v1794_v50 = vld [vmem:[#allocation8 + $0x18] sm:$0xff]   ;;  %v1796_v52 = vld [vmem:[#allocation8 + $0x50] sm:$0xff]   ;;  %v1799_v58 = vld [vmem:[#allocation8 + $0x48] sm:$0xff]  }
  0xa9   : > { %v1795_v51 = vld [vmem:[#allocation8 + $0x98] sm:$0xff]   ;;  %v1797_v55 = vld [vmem:[#allocation8 + $0x10] sm:$0xff]   ;;  %v1800_v59 = vld [vmem:[#allocation8 + $0x8] sm:$0xff]  }
  0xaa   : > { %1494 = vmatpush3.bf16.msra.mxu0 %v1767_v11  ;;  %1576 = vmatpush3.bf16.msra.mxu1 %v1768_v12  ;;  %v438_v53 = vld [vmem:[%s2328_s9] sm:$0xff]  ;;  %v1802_v61 = vld [vmem:[#allocation8 + $0x40] sm:$0xff]   ;;  %v439_v1 = vld [vmem:[%s2328_s9 + $0x8] sm:$0xf]  ;;  %s1982_s9 = scalar_lea.vmem %s2420_s19, 16 }
  0xab   : > { %1495 = vmatprep.subr.bf16.mxu0 %v1769_v13  ;;  %1577 = vmatprep.subr.bf16.mxu1 %v2072_v0  ;;  %v441_v54 = vcombine.high %v438_v53, %v438_v53  ;;  %v1798_v56 = vld [vmem:[#allocation8 + $0x90] sm:$0xff]   ;;  %v1801_v60 = vld [vmem:[#allocation8 + $0x88] sm:$0xff]   ;;  %v1803_v62 = vld [vmem:[#allocation8] sm:$0xff]   ;;  %v443_v2 = vpack.c.bf16 %v438_v53, %v438_v53  ;;  %v445_v3 = vpack.c.bf16 %v439_v1, %v439_v1  ;;  %p1983_p0 = scmp.ne.s32.totalorder %s2420_s19, %s1982_s9  ;;  %p1990_p3 = scmp.lt.s32.totalorder %s1988_s3, %s1982_s9 }
  0xac   : > { %v1804_v63 = vld [vmem:[#allocation8 + $0x80] sm:$0xff]   ;;  %v1806_v4 = vld [vmem:[#allocation10 + $0x38] sm:$0xff]   ;;  %v1807_v5 = vld [vmem:[#allocation10 + $0x30] sm:$0xff]  }
  0xad   : > { %v444_v57 = vpack.c.bf16 %v441_v54, %v441_v54  ;;  %v1808_v6 = vld [vmem:[#allocation10 + $0x28] sm:$0xff]   ;;  %v1809_v7 = vld [vmem:[#allocation10 + $0x20] sm:$0xff]   ;;  %v1810_v8 = vld [vmem:[#allocation10 + $0x18] sm:$0xff]   ;;  %p1984_p9 = pnand %p1983_p0, %p2497_p2  ;;  %p1991_p4 = por %p1990_p3, %p1989_p1 }
  0xae   : > { %1496 = vmatpush3.bf16.msra.mxu0 %v1770_v15  ;;  %1578 = vmatpush3.bf16.msra.mxu1 %v1771_v16  ;;  %v1811_v9 = vld [vmem:[#allocation10 + $0x10] sm:$0xff]   ;;  %v1812_v10 = vld [vmem:[#allocation10 + $0x8] sm:$0xff]   ;;  %v1813_v11 = vld [vmem:[#allocation10] sm:$0xff]  }
  0xaf   : > { %1497 = vmatprep.subr.bf16.mxu0 %v1772_v17  ;;  %1579 = vmatprep.subr.bf16.mxu1 %v2072_v0  ;;  %v1814_v12 = vld [vmem:[#allocation11 + $0x38] sm:$0xff]   ;;  %v1815_v13 = vld [vmem:[#allocation11 + $0x30] sm:$0xff]   ;;  %v1816_v14 = vld [vmem:[#allocation11 + $0x28] sm:$0xff]   ;;  %p1985_p11 = pneg %p1984_p9 }
  0xb0   : > { %v1817_v15 = vld [vmem:[#allocation11 + $0x20] sm:$0xff]   ;;  %v1818_v16 = vld [vmem:[#allocation11 + $0x18] sm:$0xff]   ;;  %v1819_v17 = vld [vmem:[#allocation11 + $0x10] sm:$0xff]  }
  0xb1   : > { %v446_v23 = vld [vmem:[%s2467_s6] sm:$0x1]  ;;  %v1483_v54 = vld [vmem:[%s2467_s6 + $0x2] ss:$0 sm:$0xff]  ;;  %p1992_p10 = pnand %p1991_p4, %p1985_p11 }
  0xb2   : > { %1498 = vmatpush3.bf16.msra.mxu0 %v1773_v19  ;;  %1580 = vmatpush3.bf16.msra.mxu1 %v1774_v20  ;;  %v1820_v19 = vld [vmem:[#allocation11 + $0x8] sm:$0xff]   ;;  %v1821_v20 = vld [vmem:[#allocation11] sm:$0xff]  }
  0xb3   : > { %1499 = vmatprep.subr.bf16.mxu0 %v1775_v21  ;;  %1581 = vmatprep.subr.bf16.mxu1 %v2072_v0  ;;  %v1220_v18 = vld [vmem:[%s2468_s7] sm:$0x1] }
  0xb6   : > { %1500 = vmatpush3.bf16.msra.mxu0 %v1776_v22  ;;  %1582 = vmatpush3.bf16.msra.mxu1 %v1777_v24 }
  0xb7   : > { %1501 = vmatprep.subr.bf16.mxu0 %v1778_v26  ;;  %1583 = vmatprep.subr.bf16.mxu1 %v2072_v0 }
  0xba   : > { %1502 = vmatpush3.bf16.msra.mxu0 %v1779_v30  ;;  %1584 = vmatpush3.bf16.msra.mxu1 %v1780_v32 }
  0xbb   : > { %1518 = vmatprep.subr.bf16.mxu0 %v1781_v35  ;;  %1589 = vmatprep.subr.bf16.mxu1 %v2072_v0 }
  0xbd   : > { %674 = vmatmul.mubr.bf16.vlgmr.msra.gmra.mxu0 %v435_v36  ;;  %1586 = vmatmul.mubr.bf16.vlgmr.msra.gmra.mxu1 %v437_v38  ;;  %v1442_v38 = vld [vmem:[%s2467_s6 + $0x1] ss:$0 sm:$0xff] }
  0xbe   : > { %1519 = vmatpush3.bf16.msra.mxu0 %v1782_v37  ;;  %1590 = vmatpush3.bf16.msra.mxu1 %v1783_v39 }
  0xbf   : > { %1520 = vmatprep.subr.bf16.mxu0 %v1784_v40  ;;  %1591 = vmatprep.subr.bf16.mxu1 %v2072_v0 }
  0xc0   : > { %1605 = vmatprep.mubr.msk.bf16.mxu1 %vm2073_vm0, %v2072_v0  ;;  %950 = vmatprep.mubr.bf16.mxu0 %v444_v57 }
  0xc2   : > { %1521 = vmatpush3.bf16.msra.mxu0 %v1785_v41  ;;  %1592 = vmatpush3.bf16.msra.mxu1 %v1786_v42 }
  0xc3   : > { %1522 = vmatprep.subr.bf16.mxu0 %v1787_v43  ;;  %1593 = vmatprep.subr.bf16.mxu1 %v2072_v0 }
  0xc6   : > { %1523 = vmatpush3.bf16.msra.mxu0 %v1788_v44  ;;  %1594 = vmatpush3.bf16.msra.mxu1 %v1789_v45 }
  0xc7   : > { %1524 = vmatprep.subr.bf16.mxu0 %v1790_v46  ;;  %1595 = vmatprep.subr.bf16.mxu1 %v2072_v0 }
  0xca   : > { %1525 = vmatpush3.bf16.msra.mxu0 %v1791_v47  ;;  %1596 = vmatpush3.bf16.msra.mxu1 %v1792_v48 }
  0xcb   : > { %1526 = vmatprep.subr.bf16.mxu0 %v1793_v49  ;;  %1597 = vmatprep.subr.bf16.mxu1 %v2072_v0 }
  0xce   : > { %1527 = vmatpush3.bf16.msra.mxu0 %v1794_v50  ;;  %1598 = vmatpush3.bf16.msra.mxu1 %v1795_v51 }
  0xcf   : > { %1528 = vmatprep.subr.bf16.mxu0 %v1796_v52  ;;  %1599 = vmatprep.subr.bf16.mxu1 %v2072_v0 }
  0xd2   : > { %1529 = vmatpush3.bf16.msra.mxu0 %v1797_v55  ;;  %1600 = vmatpush3.bf16.msra.mxu1 %v1798_v56 }
  0xd3   : > { %1530 = vmatprep.subr.bf16.mxu0 %v1799_v58  ;;  %1601 = vmatprep.subr.bf16.mxu1 %v2072_v0 }
  0xd6   : > { %1531 = vmatpush3.bf16.msra.mxu0 %v1800_v59  ;;  %1602 = vmatpush3.bf16.msra.mxu1 %v1801_v60 }
  0xd7   : > { %1532 = vmatprep.subr.bf16.mxu0 %v1802_v61  ;;  %1603 = vmatprep.subr.bf16.mxu1 %v2072_v0 }
  0xda   : > { %1533 = vmatpush3.bf16.msra.mxu0 %v1803_v62  ;;  %1604 = vmatpush3.bf16.msra.mxu1 %v1804_v63 }
  0xdb   : > { %1609 = vmatprep.subr.bf16.mxu0 %v2072_v0  ;;  %1629 = vmatprep.subr.bf16.mxu1 %v2072_v0 }
  0xdd   : > { %951 = vmatmul.mubr.bf16.vlgmr.msra.gmra.mxu0 %v443_v2  ;;  %1606 = vmatmul.mubr.bf16.vlgmr.msra.gmra.mxu1 %v445_v3 }
  0xde   : > { %1610 = vmatpush3.bf16.msra.mxu0 %v1806_v4  ;;  %1625 = vmatprep.mubr.msk.bf16.mxu0 %vm2073_vm0, %v2072_v0 }
  0xdf   : > { %1611 = vmatprep.subr.bf16.mxu0 %v2072_v0  ;;  %1645 = vmatprep.mubr.msk.bf16.mxu1 %vm2073_vm0, %v2072_v0 }
  0xe0   : > { %1630 = vmatpush3.bf16.msra.mxu1 %v1814_v12 }
  0xe1   : > { %1631 = vmatprep.subr.bf16.mxu1 %v2072_v0 }
  0xe2   : > { %1612 = vmatpush3.bf16.msra.mxu0 %v1807_v5 }
  0xe3   : > { %1613 = vmatprep.subr.bf16.mxu0 %v2072_v0 }
  0xe4   : > { %1632 = vmatpush3.bf16.msra.mxu1 %v1815_v13 }
  0xe5   : > { %1633 = vmatprep.subr.bf16.mxu1 %v2072_v0 }
  0xe6   : > { %1614 = vmatpush3.bf16.msra.mxu0 %v1808_v6 }
  0xe7   : > { %1615 = vmatprep.subr.bf16.mxu0 %v2072_v0 }
  0xe8   : > { %1634 = vmatpush3.bf16.msra.mxu1 %v1816_v14 }
  0xe9   : > { %1635 = vmatprep.subr.bf16.mxu1 %v2072_v0 }
  0xea   : > { %1616 = vmatpush3.bf16.msra.mxu0 %v1809_v7 }
  0xeb   : > { %1617 = vmatprep.subr.bf16.mxu0 %v2072_v0 }
  0xec   : > { %1636 = vmatpush3.bf16.msra.mxu1 %v1817_v15 }
  0xed   : > { %1637 = vmatprep.subr.bf16.mxu1 %v2072_v0 }
  0xee   : > { %1618 = vmatpush3.bf16.msra.mxu0 %v1810_v8 }
  0xef   : > { %1619 = vmatprep.subr.bf16.mxu0 %v2072_v0 }
  0xf0   : > { %1638 = vmatpush3.bf16.msra.mxu1 %v1818_v16 }
  0xf1   : > { %1639 = vmatprep.subr.bf16.mxu1 %v2072_v0 }
  0xf2   : > { %1620 = vmatpush3.bf16.msra.mxu0 %v1811_v9 }
  0xf3   : > { %1621 = vmatprep.subr.bf16.mxu0 %v2072_v0 }
  0xf4   : > { %1640 = vmatpush3.bf16.msra.mxu1 %v1819_v17 }
  0xf5   : > { %1641 = vmatprep.subr.bf16.mxu1 %v2072_v0 }
  0xf6   : > { %1622 = vmatpush3.bf16.msra.mxu0 %v1812_v10 }
  0xf7   : > { %1623 = vmatprep.subr.bf16.mxu0 %v2072_v0 }
  0xf8   : > { %1642 = vmatpush3.bf16.msra.mxu1 %v1820_v19 }
  0xf9   : > { %1643 = vmatprep.subr.bf16.mxu1 %v2072_v0 }
  0xfa   : > { %1624 = vmatpush3.bf16.msra.mxu0 %v1813_v11 }
  0xfb   : > { %1649 = vmatprep.subr.bf16.mxu0 %v2072_v0 }
  0xfc   : > { %1644 = vmatpush3.bf16.msra.mxu1 %v1821_v20 }
 0x17d   : > { %v1503_v21 = vpop.f32.mrf.mxu0  ;;  %v715_v22 = vpop.f32.mrf.mxu1 }
 0x17f   : > { %v1504_v24 = vpop.f32.mrf.mxu0  ;;  %v1587_v27 = vpop.f32.mrf.mxu1 }
 0x180   : > { %v1505_v26 = vadd.f32 %v1504_v24, %v1503_v21 }
 0x181   : > { %v1506_v28 = vpop.f32.mrf.mxu0  ;;  %v718_v30 = vpop.f32.mrf.mxu1 }
 0x182   : > { %v676_v29 = vadd.f32 %v1505_v26, %v446_v23 }
 0x183   : > { %v1507_v31 = vpop.f32.mrf.mxu0  ;;  %v1588_v33 = vpop.f32.mrf.mxu1 }
 0x184   : > { %v716_v32 = vadd.f32 %v715_v22, %v676_v29 }
 0x186   : > { %v721_v34 = vmax.f32 %v716_v32, 0.0 }
 0x188   : > { %v999_v35 = vpack.c.bf16 %v721_v34, %v721_v34 }
 0x18a   : > { %1626 = vmatmul.mubr.bf16.vlgmr.msra.gmra.mxu0 %v999_v35 }
 0x18b   : > { %1651 = vmatprep.mubr.msk.bf16.mxu0 %vm2073_vm0, %v2072_v0 }
 0x19d   : > { %v1534_v36 = vpop.f32.mrf.mxu0  ;;  %v992_v37 = vpop.f32.mrf.mxu1 }
 0x19f   : > { %v1535_v39 = vpop.f32.mrf.mxu0  ;;  %v1607_v41 = vpop.f32.mrf.mxu1 }
 0x1a0   : > { %v1536_v40 = vadd.f32 %v1535_v39, %v1534_v36 }
 0x1a1   : > { %v1537_v42 = vpop.f32.mrf.mxu0  ;;  %v995_v44 = vpop.f32.mrf.mxu1 }
 0x1a2   : > { %v953_v43 = vadd.f32 %v1536_v40, %v1442_v38 }
 0x1a3   : > { %v1538_v45 = vpop.f32.mrf.mxu0  ;;  %v1608_v47 = vpop.f32.mrf.mxu1 }
 0x1a4   : > { %v993_v46 = vadd.f32 %v992_v37, %v953_v43 }
 0x1a6   : > { %v998_v48 = vmax.f32 %v993_v46, 0.0 }
 0x1a8   : > { %v1104_v49 = vpack.c.bf16 %v998_v48, %v998_v48 }
 0x1aa   : > { %1646 = vmatmul.mubr.bf16.vlgmr.msra.gmra.mxu1 %v1104_v49 }
 0x24a   : > { %v1098_v50 = vpop.f32.mrf.mxu0 }
 0x24b   : > { %v1212_v53 = vrot.slane %v1098_v50, %v422_v25 }
 0x24c   : > { %v1627_v0 = vpop.f32.mrf.mxu0 }
 0x24e   : > { %v1101_v51 = vpop.f32.mrf.mxu0 }
 0x250   : > { %v1628_v52 = vpop.f32.mrf.mxu0 }
 0x26a   : > { %v1203_v55 = vpop.f32.mrf.mxu1 }
 0x26b   : > { %v1213_v56 = vadd.f32 %v1212_v53, %v1203_v55 }
 0x26c   : > { %v1647_v57 = vpop.f32.mrf.mxu1 }
 0x26d   : > { %v1218_v58 = vadd.f32 %v1483_v54, %v1213_v56 }
 0x26e   : > { %v1206_v59 = vpop.f32.mrf.mxu1 }
 0x26f   : > { %v1219_v60 = vmax.f32 %v1218_v58, 0.0 }
 0x270   : > { %v1648_v61 = vpop.f32.mrf.mxu1 }
 0x271   : > { %v1221_v62 = vpack.c.bf16 %v1219_v60, %v1219_v60 }
 0x273   : > { %1650 = vmatpush3.bf16.xpose.msra.mxu0 %v1221_v62 }
 0x27a   : > { %1652 = vmatmul.mubr.bf16.vlgmr.msra.gmra.mxu0 %v1220_v18 }
 0x33a   : > { %v1256_v25 = vpop.f32.mrf.mxu0 }
 0x33b   : > { %1263 = vst.msk [vmem:[%s416_s15] sm:$0x1] %vm1262_vm1, %v1256_v25 }
 0x33c   : > { %v1653_v63 = vpop.f32.mrf.mxu0 }
 0x33d   : > { %1995 = shalt.err (!%p1992_p10)
}
 0x33e   : > { %s1996_s22 = scalar_lea.hbm %s2418_s13, 16  ;;  %s2000_s14 = scalar_lea.hbm %s2469_s8, 32 }
 0x33f   : > { %p1997_p7 = scmp.ne.s32.totalorder %s2418_s13, %s1996_s22  ;;  %p2001_p8 = scmp.lt.s32.totalorder %s2418_s13, %s2469_s8 }
 0x340   : > { %p2002_p12 = scmp.lt.s32.totalorder %s2000_s14, %s1996_s22 }
 0x341   : > { %p1998_p13 = pnand %p1997_p7, %p2497_p2 }
 0x342   : > { %p2003_p6 = por %p2002_p12, %p2001_p8 }
 0x343   : > { %p1999_p5 = pneg %p1998_p13 }
 0x345   : > { %p2004_p0 = pnand %p2003_p6, %p1999_p5 }
 0x347   : > { %2007 = shalt.err (!%p2004_p0)
}
 0x348   : > { %1681 = dma.vmem_to_hbm [thread:$0]  (%p2497_p2), %s2420_s19, 16, %s2418_s13, %s1265_s17   ;;  %v1259_v1 = vpop.f32.mrf.mxu0 }
 0x34a   : > { %v1654_v2 = vpop.f32.mrf.mxu0 }
 0x34b PF: > { %s1289_s16 = sand.u32 1, %s2050_s27   ;;  %p2498_p9 = scmp.ne.s32.totalorder %s2485_s26, 0 }
 0x34c   : > { %p2499_p11 = scmp.ge.s32.totalorder %s2062_s30, 2  ;;  %s1290_s4 = scalar_lea.sflag [#allocation4], %s1289_s16 }
 0x34e   : > { %p1704_p1 = pnand %p2499_p11, %p2498_p9 }
 0x350   : > { %p1705_p3 = pneg %p1704_p1 }
 0x352   : > { %2045 = dma.done.wait (%p1705_p3), %s1290_s4, 16  }
 0x353   : > { %2047 = vsyncadd (%p1705_p3), %s1290_s4, 4294967280  ;;  %p26_p2 = scmp.ge.s32.totalorder %s2221_s21, 4   ;;  %s2500_s27 = smov %s2054_s28 }
 0x354   : > { %s2501_s28 = smov %s2058_s29  ;;  %s2502_s29 = smov %s2232_s24 }
 0x355   : > { %s2503_s30 = smov %s2221_s21  ;;  %28 = sbr.rel (!%p26_p2) target bundleno = 14 (0xe), region = 126 }
 0x35a   :  { %1294 = vsyncpa [#allocation3], 1 }
 0x35b   :  { %1296 = vsyncpa [#allocation3 + $0x1], 1 }
 0x35c   :  { %1297 = vsyncpa [#allocation6], 1 }
 0x35d   :  { %1299 = vsyncpa [#allocation6 + $0x1], 1 }
 0x35e   :  { %1300 = vsyncpa [#allocation9], 1 }
 0x35f   :  { %1301 = vsyncpa [#allocation12], 1 }
 0x360   :  { %1302 = vsyncpa [#allocation4], 1 }
 0x361   :  { %1304 = vsyncpa [#allocation4 + $0x1], 1 }

</bundles_post_ra>
